<compile_context>
chip_gen: v7x
topology: tpu7x:2x2x1
jax: 0.10.0
libtpu: 0.0.40
codegen_flags: <defaults>
</compile_context>

<pallas_src>
import jax
import jax.numpy as jnp
from jax.experimental import pallas as pl
from jax.experimental.pallas import tpu as pltpu

NUM_CLASSES = 12   # num_classes = len(classes)  (PASCAL3D-style)
NDIM = 3           # ndim = 3
OUT_PAD = 128      # lane-dense output width; real result lives in [:, :NDIM]


def regression_kernel(x_ref, fw_ref, fb_ref, w1_ref, b1_ref, w2_ref, b2_ref,
                      w3_ref, b3_ref, oh_ref, m2_ref, out_ref):
    # ---- stand-in feature extractor -------------------------------------
    # TODO(synk): resnet50('layer4') / vgg13('fc6') backbones are external
    # code not present in the snippet; deterministic stand-in = global
    # average pool (over H*W) + Linear(C, N0) + ReLU, fused here.
    pooled = jnp.mean(x_ref[...], axis=-1)                               # [B, C]
    feat = jnp.dot(pooled, fw_ref[...],
                   preferred_element_type=jnp.float32) + fb_ref[...]     # [B, N0]
    feat = jnp.maximum(feat, 0.0)

    # ---- all K 3-layer heads as lane-dense matmuls -----------------------
    h1 = jnp.dot(feat.astype(jnp.bfloat16), w1_ref[...],
                 preferred_element_type=jnp.float32) + b1_ref[...]       # [B, K*N1]
    h1 = jnp.maximum(h1, 0.0)
    h2 = jnp.dot(h1.astype(jnp.bfloat16), w2_ref[...],
                 preferred_element_type=jnp.float32) + b2_ref[...]       # [B, K*N2]
    h2 = jnp.maximum(h2, 0.0)

    # one-hot bmm == keep only the labeled class's N2 block, then contract
    # with the stacked (row-major) third-layer weights; add the selected bias.
    h2m = h2 * m2_ref[...]                                               # [B, K*N2]
    y = jnp.dot(h2m, w3_ref[...],
                preferred_element_type=jnp.float32)                      # [B, OUT_PAD]
    y = y + jnp.dot(oh_ref[...], b3_ref[...],
                    preferred_element_type=jnp.float32)                  # bias of labeled head
    out_ref[...] = jnp.pi * jnp.tanh(y)                                  # lane-dense store


def regression_model_forward(x_nchw, label, params):
    """x_nchw: [B, C, H, W] float32, label: [B, 1] int32 -> [B, ndim] float32."""
    feat_w, feat_b = params["feat_w"], params["feat_b"]   # [C, N0], [N0]
    w1, b1 = params["w1"], params["b1"]                   # [K, N0, N1], [K, 1, N1]
    w2, b2 = params["w2"], params["b2"]                   # [K, N1, N2], [K, 1, N2]
    w3, b3 = params["w3"], params["b3"]                   # [K, N2, ndim], [K, 1, ndim]

    B, C, H, W = x_nchw.shape
    K, N0, N1 = w1.shape
    N2 = w2.shape[2]
    ndim = w3.shape[2]

    # ---- one-time parameter restructuring (plain XLA, fused under jit) ---
    # W1 concatenated along heads: column index = k*N1 + j
    w1c = jnp.transpose(w1, (1, 0, 2)).reshape(N0, K * N1).astype(jnp.bfloat16)
    b1c = b1.reshape(1, K * N1).astype(jnp.float32)
    # W2 block-diagonal: [k*N1 + i, l*N2 + j] = w2[k,i,j] * (k == l)
    eye = jnp.eye(K, dtype=jnp.float32)
    w2bd = (w2[:, :, None, :] * eye[:, None, :, None]).reshape(K * N1, K * N2)
    w2bd = w2bd.astype(jnp.bfloat16)
    b2c = b2.reshape(1, K * N2).astype(jnp.float32)
    # W3 stacked row-major ([k*N2 + i, d] = w3[k,i,d]) and lane-padded to 128.
    w3s = jnp.pad(w3.reshape(K * N2, ndim).astype(jnp.float32),
                  ((0, 0), (0, OUT_PAD - ndim)))
    b3s = jnp.pad(b3.reshape(K, ndim).astype(jnp.float32),
                  ((0, 0), (0, OUT_PAD - ndim)))

    # label -> one-hot [B, K] and its N2-expanded lane mask [B, K*N2]
    onehot = jax.nn.one_hot(label[:, 0], K, dtype=jnp.float32)
    m2 = jnp.repeat(onehot, N2, axis=1)

    x_flat = x_nchw.reshape(B, C, H * W).astype(jnp.float32)
    fw = feat_w.astype(jnp.float32)
    fb = feat_b.reshape(1, N0).astype(jnp.float32)

    # Everything resident in VMEM, single invocation (no grid): total working
    # set ~1.2 MiB, far below VMEM on v5e/v6e/v7x.
    vmem = pl.BlockSpec(memory_space=pltpu.MemorySpace.VMEM)
    out_full = pl.pallas_call(
        regression_kernel,
        out_shape=jax.ShapeDtypeStruct((B, OUT_PAD), jnp.float32),
        in_specs=[vmem] * 11,
        out_specs=vmem,
    )(x_flat, fw, fb, w1c, b1c, w2bd, b2c, w3s, b3s, onehot, m2)

    return out_full[:, :ndim]


def _reference_forward(x_nchw, label, params):
    """Pure-JAX f32 reference mirroring the PyTorch forward."""
    pooled = jnp.mean(x_nchw, axis=(2, 3))
    feat = jnp.maximum(pooled @ params["feat_w"] + params["feat_b"], 0.0)

    def head(w1, b1, w2, b2, w3, b3):
        h = jnp.maximum(feat @ w1 + b1[0], 0.0)
        h = jnp.maximum(h @ w2 + b2[0], 0.0)
        return h @ w3 + b3[0]                                   # [B, ndim]

    per_class = jax.vmap(head)(params["w1"], params["b1"],
                               params["w2"], params["b2"],
                               params["w3"], params["b3"])      # [K, B, ndim]
    x = jnp.transpose(per_class, (1, 2, 0))                     # [B, ndim, K]
    onehot = jax.nn.one_hot(label[:, 0], per_class.shape[0],
                            dtype=jnp.float32)[:, :, None]      # [B, K, 1]
    y = jnp.squeeze(jnp.matmul(x, onehot), 2)                   # [B, ndim]
    return jnp.pi * jnp.tanh(y)


if __name__ == "__main__":
    B, C, H, W = 8, 3, 32, 32
    N0, N1, N2 = 128, 64, 32
    K, ndim = NUM_CLASSES, NDIM

    key = jax.random.PRNGKey(0)
    ks = jax.random.split(key, 10)

    x = jax.random.normal(ks[0], (B, C, H, W), dtype=jnp.float32)
    label = jax.random.randint(ks[1], (B, 1), 0, K, dtype=jnp.int32)

    params = {
        "feat_w": 0.05 * jax.random.normal(ks[2], (C, N0), dtype=jnp.float32),
        "feat_b": 0.05 * jax.random.normal(ks[3], (N0,), dtype=jnp.float32),
        "w1": 0.05 * jax.random.normal(ks[4], (K, N0, N1), dtype=jnp.float32),
        "b1": 0.05 * jax.random.normal(ks[5], (K, 1, N1), dtype=jnp.float32),
        "w2": 0.05 * jax.random.normal(ks[6], (K, N1, N2), dtype=jnp.float32),
        "b2": 0.05 * jax.random.normal(ks[7], (K, 1, N2), dtype=jnp.float32),
        "w3": 0.05 * jax.random.normal(ks[8], (K, N2, ndim), dtype=jnp.float32),
        "b3": 0.05 * jax.random.normal(ks[9], (K, 1, ndim), dtype=jnp.float32),
    }

    fwd = jax.jit(regression_model_forward)
    y = jax.block_until_ready(fwd(x, label, params))

    y_ref = _reference_forward(x, label, params)
    assert y.shape == (B, ndim)
    # bf16 weight path vs f32 reference: errors are ~1e-3 for these scales.
    assert bool(jnp.max(jnp.abs(y - y_ref)) < 2e-2), "mismatch vs pure-JAX reference"

    print("KERNEL_OK")
</pallas_src>

<mosaic_0001>
module attributes {stable_mosaic.version = 11 : i64} {
  func.func @regression_kernel(%arg0: memref<8x3x1024xf32, #tpu.memory_space<vmem>>, %arg1: memref<3x128xf32, #tpu.memory_space<vmem>>, %arg2: memref<1x128xf32, #tpu.memory_space<vmem>>, %arg3: memref<128x768xbf16, #tpu.memory_space<vmem>>, %arg4: memref<1x768xf32, #tpu.memory_space<vmem>>, %arg5: memref<768x384xbf16, #tpu.memory_space<vmem>>, %arg6: memref<1x384xf32, #tpu.memory_space<vmem>>, %arg7: memref<384x128xf32, #tpu.memory_space<vmem>>, %arg8: memref<12x128xf32, #tpu.memory_space<vmem>>, %arg9: memref<8x12xf32, #tpu.memory_space<vmem>>, %arg10: memref<8x384xf32, #tpu.memory_space<vmem>>, %arg11: memref<8x128xf32, #tpu.memory_space<vmem>>) attributes {dimension_semantics = [], scalar_prefetch = 0 : i64, scratch_operands = 0 : i64, tpu.core_type = #tpu.core_type<tc>} {
    %c0 = arith.constant 0 : index
    %c0_0 = arith.constant 0 : index
    %c0_1 = arith.constant 0 : index
    %0 = vector.load %arg0[%c0, %c0_0, %c0_1] : memref<8x3x1024xf32, #tpu.memory_space<vmem>>, vector<8x3x1024xf32>
    %cst = arith.constant dense<0.000000e+00> : vector<8x3xf32>
    %1 = vector.multi_reduction <add>, %0, %cst [2] : vector<8x3x1024xf32> to vector<8x3xf32>
    %cst_2 = arith.constant 1.024000e+03 : f32
    %2 = vector.broadcast %cst_2 : f32 to vector<8x3xf32>
    %3 = arith.divf %1, %2 : vector<8x3xf32>
    %c0_3 = arith.constant 0 : index
    %c0_4 = arith.constant 0 : index
    %4 = vector.load %arg1[%c0_3, %c0_4] : memref<3x128xf32, #tpu.memory_space<vmem>>, vector<3x128xf32>
    %cst_5 = arith.constant dense<0.000000e+00> : vector<8x128xf32>
    %5 = tpu.matmul %3, %4, %cst_5 {dimension_numbers = #tpu.dot_dimension_numbers<[1], [0], [0], [1], [0, 0, 1, 1], [], []>} : vector<8x3xf32>, vector<3x128xf32>, vector<8x128xf32> -> vector<8x128xf32>
    %c0_6 = arith.constant 0 : index
    %c0_7 = arith.constant 0 : index
    %6 = vector.load %arg2[%c0_6, %c0_7] : memref<1x128xf32, #tpu.memory_space<vmem>>, vector<1x128xf32>
    %7 = vector.broadcast %6 : vector<1x128xf32> to vector<8x128xf32>
    %8 = arith.addf %5, %7 : vector<8x128xf32>
    %cst_8 = arith.constant 0.000000e+00 : f32
    %9 = vector.broadcast %cst_8 : f32 to vector<8x128xf32>
    %10 = arith.maximumf %8, %9 : vector<8x128xf32>
    %11 = arith.truncf %10 : vector<8x128xf32> to vector<8x128xbf16>
    %c0_9 = arith.constant 0 : index
    %c0_10 = arith.constant 0 : index
    %12 = vector.load %arg3[%c0_9, %c0_10] : memref<128x768xbf16, #tpu.memory_space<vmem>>, vector<128x768xbf16>
    %cst_11 = arith.constant dense<0.000000e+00> : vector<8x768xf32>
    %13 = tpu.matmul %11, %12, %cst_11 {dimension_numbers = #tpu.dot_dimension_numbers<[1], [0], [0], [1], [0, 0, 1, 1], [], []>} : vector<8x128xbf16>, vector<128x768xbf16>, vector<8x768xf32> -> vector<8x768xf32>
    %c0_12 = arith.constant 0 : index
    %c0_13 = arith.constant 0 : index
    %14 = vector.load %arg4[%c0_12, %c0_13] : memref<1x768xf32, #tpu.memory_space<vmem>>, vector<1x768xf32>
    %15 = vector.broadcast %14 : vector<1x768xf32> to vector<8x768xf32>
    %16 = arith.addf %13, %15 : vector<8x768xf32>
    %cst_14 = arith.constant 0.000000e+00 : f32
    %17 = vector.broadcast %cst_14 : f32 to vector<8x768xf32>
    %18 = arith.maximumf %16, %17 : vector<8x768xf32>
    %19 = arith.truncf %18 : vector<8x768xf32> to vector<8x768xbf16>
    %c0_15 = arith.constant 0 : index
    %c0_16 = arith.constant 0 : index
    %20 = vector.load %arg5[%c0_15, %c0_16] : memref<768x384xbf16, #tpu.memory_space<vmem>>, vector<768x384xbf16>
    %cst_17 = arith.constant dense<0.000000e+00> : vector<8x384xf32>
    %21 = tpu.matmul %19, %20, %cst_17 {dimension_numbers = #tpu.dot_dimension_numbers<[1], [0], [0], [1], [0, 0, 1, 1], [], []>} : vector<8x768xbf16>, vector<768x384xbf16>, vector<8x384xf32> -> vector<8x384xf32>
    %c0_18 = arith.constant 0 : index
    %c0_19 = arith.constant 0 : index
    %22 = vector.load %arg6[%c0_18, %c0_19] : memref<1x384xf32, #tpu.memory_space<vmem>>, vector<1x384xf32>
    %23 = vector.broadcast %22 : vector<1x384xf32> to vector<8x384xf32>
    %24 = arith.addf %21, %23 : vector<8x384xf32>
    %cst_20 = arith.constant 0.000000e+00 : f32
    %25 = vector.broadcast %cst_20 : f32 to vector<8x384xf32>
    %26 = arith.maximumf %24, %25 : vector<8x384xf32>
    %c0_21 = arith.constant 0 : index
    %c0_22 = arith.constant 0 : index
    %27 = vector.load %arg10[%c0_21, %c0_22] : memref<8x384xf32, #tpu.memory_space<vmem>>, vector<8x384xf32>
    %28 = arith.mulf %26, %27 : vector<8x384xf32>
    %c0_23 = arith.constant 0 : index
    %c0_24 = arith.constant 0 : index
    %29 = vector.load %arg7[%c0_23, %c0_24] : memref<384x128xf32, #tpu.memory_space<vmem>>, vector<384x128xf32>
    %cst_25 = arith.constant dense<0.000000e+00> : vector<8x128xf32>
    %30 = tpu.matmul %28, %29, %cst_25 {dimension_numbers = #tpu.dot_dimension_numbers<[1], [0], [0], [1], [0, 0, 1, 1], [], []>} : vector<8x384xf32>, vector<384x128xf32>, vector<8x128xf32> -> vector<8x128xf32>
    %c0_26 = arith.constant 0 : index
    %c0_27 = arith.constant 0 : index
    %31 = vector.load %arg9[%c0_26, %c0_27] : memref<8x12xf32, #tpu.memory_space<vmem>>, vector<8x12xf32>
    %c0_28 = arith.constant 0 : index
    %c0_29 = arith.constant 0 : index
    %32 = vector.load %arg8[%c0_28, %c0_29] : memref<12x128xf32, #tpu.memory_space<vmem>>, vector<12x128xf32>
    %cst_30 = arith.constant dense<0.000000e+00> : vector<8x128xf32>
    %33 = tpu.matmul %31, %32, %cst_30 {dimension_numbers = #tpu.dot_dimension_numbers<[1], [0], [0], [1], [0, 0, 1, 1], [], []>} : vector<8x12xf32>, vector<12x128xf32>, vector<8x128xf32> -> vector<8x128xf32>
    %34 = arith.addf %30, %33 : vector<8x128xf32>
    %35 = math.tanh %34 : vector<8x128xf32>
    %cst_31 = arith.constant 3.14159274 : f32
    %36 = vector.broadcast %cst_31 : f32 to vector<8x128xf32>
    %37 = arith.mulf %36, %35 : vector<8x128xf32>
    %c0_32 = arith.constant 0 : index
    %c0_33 = arith.constant 0 : index
    %38 = vector.load %arg11[%c0_32, %c0_33] : memref<8x128xf32, #tpu.memory_space<vmem>>, vector<8x128xf32>
    tpu.vector_store %arg11[%c0_32, %c0_33], %37 {strides = array<i32>} : memref<8x128xf32, #tpu.memory_space<vmem>>, vector<8x128xf32>,
    return
  }
}

</mosaic_0001>

<bundles_post_ra>
// kernel: regression_model_forward.1
= control target key start
LH: loop header
LB: loop body
LE: loop exit
PB: predicated region body
PF: predicated region fallthrough
CT: control target
= control target key end

     0   :  { %vm167_vm0 = vcmask 1042432   ;;  %vm3159_vm1 = vmmov 0   ;;  %vm363_vm2 = vcmask 1041409   ;;  %vm365_vm3 = vcmask 1042434   ;;  %s4205_s0 = inlined_call_operand.vmem [shape: f32[8,3,1024], index: 0, kind: input, shape index: {}]   ;;  %s4206_s1 = inlined_call_operand.vmem [shape: f32[3,128], index: 1, kind: input, shape index: {}]   ;;  %s4207_s3 = inlined_call_operand.vmem [shape: bf16[128,768], index: 3, kind: input, shape index: {}]   ;;  %s4208_s5 = inlined_call_operand.vmem [shape: bf16[768,384], index: 5, kind: input, shape index: {}]   ;;  %s4209_s2 = inlined_call_operand.vmem [shape: f32[1,128], index: 2, kind: input, shape index: {}]   ;;  %s4210_s4 = inlined_call_operand.vmem [shape: f32[1,768], index: 4, kind: input, shape index: {}]   ;;  %s4211_s8 = inlined_call_operand.vmem [shape: f32[12,128], index: 8, kind: input, shape index: {}]   ;;  %s4212_s7 = inlined_call_operand.vmem [shape: f32[384,128], index: 7, kind: input, shape index: {}]   ;;  %s4213_s9 = inlined_call_operand.vmem [shape: f32[8,12], index: 9, kind: input, shape index: {}]   ;;  %s4214_s6 = inlined_call_operand.vmem [shape: f32[1,384], index: 6, kind: input, shape index: {}]   ;;  %s4215_s10 = inlined_call_operand.vmem [shape: f32[8,384], index: 10, kind: input, shape index: {}]   ;;  %s4216_s11 = inlined_call_operand.vmem [shape: f32[8,128], index: 11, kind: output, shape index: {}]  }
   0x1   :  { %v39_v0 = vld [vmem:[%s4205_s0] sm:$0x77]  ;;  %v40_v1 = vld [vmem:[%s4205_s0 + $0x8] sm:$0x77]  ;;  %v41_v2 = vld [vmem:[%s4205_s0 + $0x10] sm:$0x77] }
   0x2   :  { %v42_v3 = vld [vmem:[%s4205_s0 + $0x18] sm:$0x77]  ;;  %v103_v4 = vcombine.high %v39_v0, %v39_v0  ;;  %v104_v5 = vcombine.high %v40_v1, %v40_v1  ;;  %v168_v6 = vsel %vm167_vm0, %v39_v0, 0.0  ;;  %v47_v7 = vld [vmem:[%s4205_s0 + $0x40] sm:$0x77]  ;;  %v105_v9 = vcombine.high %v41_v2, %v41_v2 }
   0x3   :  { %v48_v8 = vld [vmem:[%s4205_s0 + $0x48] sm:$0x77]  ;;  %v171_v11 = vsel %vm167_vm0, %v40_v1, 0.0  ;;  %v49_v12 = vld [vmem:[%s4205_s0 + $0x50] sm:$0x77]  ;;  %v111_v13 = vcombine.high %v47_v7, %v47_v7  ;;  %v106_v14 = vcombine.high %v42_v3, %v42_v3  ;;  %v175_v16 = vsel %vm167_vm0, %v41_v2, 0.0 }
   0x4   :  { %v169_v10 = vsel %vm167_vm0, %v103_v4, 0.0  ;;  %v50_v17 = vld [vmem:[%s4205_s0 + $0x58] sm:$0x77]  ;;  %v112_v18 = vcombine.high %v48_v8, %v48_v8  ;;  %v43_v19 = vld [vmem:[%s4205_s0 + $0x20] sm:$0x77]  ;;  %v173_v20 = vsel %vm167_vm0, %v104_v5, 0.0  ;;  %v113_v27 = vcombine.high %v49_v12, %v49_v12 }
   0x5   :  { %v170_v15 = vadd.f32 %v169_v10, %v168_v6  ;;  %v202_v21 = vsel %vm167_vm0, %v47_v7, 0.0  ;;  %v203_v22 = vsel %vm167_vm0, %v111_v13, 0.0  ;;  %v205_v23 = vsel %vm167_vm0, %v48_v8, 0.0  ;;  %v44_v24 = vld [vmem:[%s4205_s0 + $0x28] sm:$0x77] }
   0x6   :  { %v179_v26 = vsel %vm167_vm0, %v42_v3, 0.0  ;;  %v204_v28 = vadd.f32 %v203_v22, %v202_v21  ;;  %v177_v29 = vsel %vm167_vm0, %v105_v9, 0.0  ;;  %v114_v30 = vcombine.high %v50_v17, %v50_v17  ;;  %v45_v36 = vld [vmem:[%s4205_s0 + $0x30] sm:$0x77]  ;;  %v51_v42 = vld [vmem:[%s4205_s0 + $0x60] sm:$0x77] }
   0x7   :  { %v172_v25 = vadd.f32 %v171_v11, %v170_v15  ;;  %v207_v31 = vsel %vm167_vm0, %v112_v18, 0.0  ;;  %v107_v32 = vcombine.high %v43_v19, %v43_v19  ;;  %v181_v34 = vsel %vm167_vm0, %v106_v14, 0.0  ;;  %v46_v46 = vld [vmem:[%s4205_s0 + $0x38] sm:$0x77]  ;;  %v52_v48 = vld [vmem:[%s4205_s0 + $0x68] sm:$0x77] }
   0x8   :  { %v206_v35 = vadd.f32 %v205_v23, %v204_v28  ;;  %v108_v37 = vcombine.high %v44_v24, %v44_v24  ;;  %v209_v38 = vsel %vm167_vm0, %v49_v12, 0.0  ;;  %v185_v39 = vsel %vm167_vm0, %v43_v19, 0.0  ;;  %v53_v56 = vld [vmem:[%s4205_s0 + $0x70] sm:$0x77]  ;;  %v55_v2 = vld [vmem:[%s4205_s0 + $0x80] sm:$0x77] }
   0x9   :  { %v174_v33 = vadd.f32 %v173_v20, %v172_v25  ;;  %v186_v40 = vsel %vm167_vm0, %v107_v32, 0.0  ;;  %v188_v41 = vsel %vm167_vm0, %v44_v24, 0.0  ;;  %v211_v45 = vsel %vm167_vm0, %v113_v27, 0.0  ;;  %v56_v7 = vld [vmem:[%s4205_s0 + $0x88] sm:$0x77] }
   0xa   :  { %v208_v44 = vadd.f32 %v207_v31, %v206_v35  ;;  %v187_v47 = vadd.f32 %v186_v40, %v185_v39  ;;  %v213_v49 = vsel %vm167_vm0, %v50_v17, 0.0  ;;  %v215_v50 = vsel %vm167_vm0, %v114_v30, 0.0  ;;  %v54_v11 = vld [vmem:[%s4205_s0 + $0x78] sm:$0x77]  ;;  %v57_v20 = vld [vmem:[%s4205_s0 + $0x90] sm:$0x77] }
   0xb   :  { %v176_v43 = vadd.f32 %v175_v16, %v174_v33  ;;  %v109_v51 = vcombine.high %v45_v36, %v45_v36  ;;  %v190_v52 = vsel %vm167_vm0, %v108_v37, 0.0  ;;  %v115_v57 = vcombine.high %v51_v42, %v51_v42  ;;  %v60_v31 = vld [vmem:[%s4205_s0 + $0xa8] sm:$0x77]  ;;  %v58_v37 = vld [vmem:[%s4205_s0 + $0x98] sm:$0x77] }
   0xc   :  { %v210_v54 = vadd.f32 %v209_v38, %v208_v44  ;;  %v189_v55 = vadd.f32 %v188_v41, %v187_v47  ;;  %v110_v58 = vcombine.high %v46_v46, %v46_v46  ;;  %v192_v59 = vsel %vm167_vm0, %v45_v36, 0.0 }
   0xd   :  { %v178_v53 = vadd.f32 %v177_v29, %v176_v43  ;;  %v116_v60 = vcombine.high %v52_v48, %v52_v48  ;;  %v219_v61 = vsel %vm167_vm0, %v51_v42, 0.0  ;;  %v220_v1 = vsel %vm167_vm0, %v115_v57, 0.0  ;;  %v61_v43 = vld [vmem:[%s4205_s0 + $0xb0] sm:$0x77] }
   0xe   :  { %v212_v63 = vadd.f32 %v211_v45, %v210_v54  ;;  %v191_v0 = vadd.f32 %v190_v52, %v189_v55  ;;  %v194_v3 = vsel %vm167_vm0, %v109_v51, 0.0  ;;  %v117_v4 = vcombine.high %v53_v56, %v53_v56  ;;  %v63_v45 = vld [vmem:[%s4205_s0 + $0xc0] sm:$0x77]  ;;  %v62_v54 = vld [vmem:[%s4205_s0 + $0xb8] sm:$0x77] }
   0xf   :  { %v180_v62 = vadd.f32 %v179_v26, %v178_v53  ;;  %v221_v5 = vadd.f32 %v220_v1, %v219_v61  ;;  %v222_v6 = vsel %vm167_vm0, %v52_v48, 0.0  ;;  %v224_v12 = vsel %vm167_vm0, %v116_v60, 0.0  ;;  %v59_v26 = vld [vmem:[%s4205_s0 + $0xa0] sm:$0x77] }
  0x10   :  { %v214_v9 = vadd.f32 %v213_v49, %v212_v63  ;;  %v193_v10 = vadd.f32 %v192_v59, %v191_v0  ;;  %v196_v13 = vsel %vm167_vm0, %v46_v46, 0.0  ;;  %v198_v14 = vsel %vm167_vm0, %v110_v58, 0.0 }
  0x11   :  { %v182_v8 = vadd.f32 %v181_v34, %v180_v62  ;;  %v223_v15 = vadd.f32 %v222_v6, %v221_v5  ;;  %v119_v16 = vcombine.high %v55_v2, %v55_v2  ;;  %v226_v19 = vsel %vm167_vm0, %v53_v56, 0.0  ;;  %v67_v5 = vld [vmem:[%s4205_s0 + $0xe0] sm:$0x77] }
  0x12   :  { %v216_v17 = vadd.f32 %v215_v50, %v214_v9  ;;  %v195_v18 = vadd.f32 %v194_v3, %v193_v10  ;;  %v120_v21 = vcombine.high %v56_v7, %v56_v7  ;;  %v118_v22 = vcombine.high %v54_v11, %v54_v11  ;;  %v64_v50 = vld [vmem:[%s4205_s0 + $0xc8] sm:$0x77]  ;;  %v65_v3 = vld [vmem:[%s4205_s0 + $0xd0] sm:$0x77] }
  0x13   :  { %183 = vadd.xlane.f32.xlu0 %v182_v8  ;;  %v225_v23 = vadd.f32 %v224_v12, %v223_v15  ;;  %v236_v24 = vsel %vm167_vm0, %v55_v2, 0.0  ;;  %v237_v25 = vsel %vm167_vm0, %v119_v16, 0.0  ;;  %v228_v28 = vsel %vm167_vm0, %v117_v4, 0.0  ;;  %v68_v10 = vld [vmem:[%s4205_s0 + $0xe8] sm:$0x77] }
  0x14   :  { %217 = vadd.xlane.f32.xlu1 %v216_v17  ;;  %v197_v27 = vadd.f32 %v196_v13, %v195_v18  ;;  %v238_v29 = vadd.f32 %v237_v25, %v236_v24  ;;  %v239_v30 = vsel %vm167_vm0, %v56_v7, 0.0  ;;  %v121_v33 = vcombine.high %v57_v20, %v57_v20  ;;  %v66_v16 = vld [vmem:[%s4205_s0 + $0xd8] sm:$0x77] }
  0x15   :  { %v227_v32 = vadd.f32 %v226_v19, %v225_v23  ;;  %v241_v34 = vsel %vm167_vm0, %v120_v21, 0.0  ;;  %v230_v36 = vsel %vm167_vm0, %v54_v11, 0.0  ;;  %v123_v39 = vcombine.high %v59_v26, %v59_v26  ;;  %v69_v23 = vld [vmem:[%s4205_s0 + $0xf0] sm:$0x77] }
  0x16   :  { %v199_v35 = vadd.f32 %v198_v14, %v197_v27  ;;  %v240_v38 = vadd.f32 %v239_v30, %v238_v29  ;;  %v232_v41 = vsel %vm167_vm0, %v118_v22, 0.0  ;;  %v243_v42 = vsel %vm167_vm0, %v57_v20, 0.0 }
  0x17   :  { %v229_v40 = vadd.f32 %v228_v28, %v227_v32  ;;  %v124_v44 = vcombine.high %v60_v31, %v60_v31  ;;  %v253_v47 = vsel %vm167_vm0, %v59_v26, 0.0  ;;  %v254_v48 = vsel %vm167_vm0, %v123_v39, 0.0 }
  0x18   :  { %200 = vadd.xlane.f32.xlu0 %v199_v35  ;;  %v242_v46 = vadd.f32 %v241_v34, %v240_v38  ;;  %v256_v49 = vsel %vm167_vm0, %v60_v31, 0.0  ;;  %v122_v52 = vcombine.high %v58_v37, %v58_v37  ;;  %v245_v53 = vsel %vm167_vm0, %v121_v33, 0.0  ;;  %v70_v38 = vld [vmem:[%s4205_s0 + $0xf8] sm:$0x77] }
  0x19   :  { %v231_v51 = vadd.f32 %v230_v36, %v229_v40  ;;  %v255_v55 = vadd.f32 %v254_v48, %v253_v47  ;;  %v247_v57 = vsel %vm167_vm0, %v58_v37, 0.0  ;;  %v125_v58 = vcombine.high %v61_v43, %v61_v43 }
  0x1a   :  { %v244_v56 = vadd.f32 %v243_v42, %v242_v46  ;;  %v258_v59 = vsel %vm167_vm0, %v124_v44, 0.0  ;;  %v127_v62 = vcombine.high %v63_v45, %v63_v45  ;;  %v128_v63 = vcombine.high %v64_v50, %v64_v50 }
  0x1b   :  { %v233_v60 = vadd.f32 %v232_v41, %v231_v51  ;;  %v257_v61 = vadd.f32 %v256_v49, %v255_v55  ;;  %v126_v1 = vcombine.high %v62_v54, %v62_v54  ;;  %v260_v2 = vsel %vm167_vm0, %v61_v43, 0.0 }
  0x1c   :  { %v246_v0 = vadd.f32 %v245_v53, %v244_v56  ;;  %v270_v4 = vsel %vm167_vm0, %v63_v45, 0.0  ;;  %v249_v6 = vsel %vm167_vm0, %v122_v52, 0.0  ;;  %v271_v8 = vsel %vm167_vm0, %v127_v62, 0.0  ;;  %v2900_v62 = vld [vmem:[%s4207_s3 + $0x30] ss:$24 sps:$4 sm:$0xff]  }
  0x1d   :  { %234 = vadd.xlane.f32.xlu1 %v233_v60  ;;  %v259_v7 = vadd.f32 %v258_v59, %v257_v61  ;;  %v273_v9 = vsel %vm167_vm0, %v64_v50, 0.0  ;;  %v262_v12 = vsel %vm167_vm0, %v125_v58, 0.0  ;;  %v264_v13 = vsel %vm167_vm0, %v62_v54, 0.0  ;;  %v2892_v58 = vld [vmem:[%s4207_s3 + $0x4] ss:$24 sps:$4 sm:$0xff]  }
  0x1e   :  { %v248_v11 = vadd.f32 %v247_v57, %v246_v0  ;;  %v272_v14 = vadd.f32 %v271_v8, %v270_v4  ;;  %v129_v17 = vcombine.high %v65_v3, %v65_v3  ;;  %v275_v18 = vsel %vm167_vm0, %v128_v63, 0.0  ;;  %v313_v57 = vld [vmem:[%s4206_s1] sm:$0x7]  ;;  %775 = vmatprep.subr.bf16.mxu1 %v2892_v58  ;;  %v2897_v60 = vld [vmem:[%s4207_s3 + $0xc] ss:$24 sps:$4 sm:$0xff]  }
  0x1f   :  { %v261_v15 = vadd.f32 %v260_v2, %v259_v7  ;;  %v131_v19 = vcombine.high %v67_v5, %v67_v5  ;;  %v266_v21 = vsel %vm167_vm0, %v126_v1, 0.0  ;;  %v132_v24 = vcombine.high %v68_v10, %v68_v10  ;;  %v2894_v59 = vld [vmem:[%s4207_s3] ss:$24 sps:$4 sm:$0xff]   ;;  %v2898_v61 = vld [vmem:[%s4207_s3 + $0x34] ss:$24 sps:$4 sm:$0xff]  }
  0x20   :  { %v250_v20 = vadd.f32 %v249_v6, %v248_v11  ;;  %v274_v22 = vadd.f32 %v273_v9, %v272_v14  ;;  %v277_v26 = vsel %vm167_vm0, %v65_v3, 0.0  ;;  %v287_v27 = vsel %vm167_vm0, %v67_v5, 0.0  ;;  %776 = vmatpush1.bf16.msra.mxu1 %v2894_v59  ;;  %v2904_v63 = vld [vmem:[%s4207_s3 + $0x64] ss:$24 sps:$4 sm:$0xff]   ;;  %v2906_v0 = vld [vmem:[%s4207_s3 + $0x60] ss:$24 sps:$4 sm:$0xff]  }
  0x21   :  { %v263_v25 = vadd.f32 %v262_v12, %v261_v15  ;;  %v288_v28 = vsel %vm167_vm0, %v131_v19, 0.0  ;;  %v130_v29 = vcombine.high %v66_v16, %v66_v16  ;;  %v290_v32 = vsel %vm167_vm0, %v68_v10, 0.0  ;;  %777 = vmatprep.subr.bf16.mxu1 %v2898_v61  ;;  %v2910_v1 = vld [vmem:[%s4207_s3 + $0x94] ss:$24 sps:$4 sm:$0xff]   ;;  %v2912_v2 = vld [vmem:[%s4207_s3 + $0x90] ss:$24 sps:$4 sm:$0xff]  }
  0x22   :  { %251 = vadd.xlane.f32.xlu0 %v250_v20  ;;  %v276_v30 = vadd.f32 %v275_v18, %v274_v22  ;;  %v289_v31 = vadd.f32 %v288_v28, %v287_v27  ;;  %v279_v34 = vsel %vm167_vm0, %v129_v17, 0.0  ;;  %v133_v35 = vcombine.high %v69_v23, %v69_v23  ;;  %v2916_v3 = vld [vmem:[%s4207_s3 + $0xc4] ss:$24 sps:$4 sm:$0xff]   ;;  %v2918_v4 = vld [vmem:[%s4207_s3 + $0xc0] ss:$24 sps:$4 sm:$0xff]  }
  0x23   :  { %v265_v33 = vadd.f32 %v264_v13, %v263_v25  ;;  %v292_v36 = vsel %vm167_vm0, %v132_v24, 0.0  ;;  %v281_v41 = vsel %vm167_vm0, %v66_v16, 0.0  ;;  %v294_v42 = vsel %vm167_vm0, %v69_v23, 0.0  ;;  %v2922_v5 = vld [vmem:[%s4207_s3 + $0xf4] ss:$24 sps:$4 sm:$0xff]  }
  0x24   :  { %v278_v37 = vadd.f32 %v277_v26, %v276_v30  ;;  %v291_v39 = vadd.f32 %v290_v32, %v289_v31  ;;  %v283_v45 = vsel %vm167_vm0, %v130_v29, 0.0  ;;  %v134_v46 = vcombine.high %v70_v38, %v70_v38  ;;  %778 = vmatpush1.bf16.msra.mxu1 %v2900_v62  ;;  %v2924_v6 = vld [vmem:[%s4207_s3 + $0xf0] ss:$24 sps:$4 sm:$0xff]   ;;  %v2928_v7 = vld [vmem:[%s4207_s3 + $0x124] ss:$24 sps:$4 sm:$0xff]  }
  0x25   :  { %v267_v40 = vadd.f32 %v266_v21, %v265_v33  ;;  %v296_v47 = vsel %vm167_vm0, %v133_v35, 0.0  ;;  %v298_v50 = vsel %vm167_vm0, %v70_v38, 0.0  ;;  %v3158_v56 = vmov 0.0   ;;  %779 = vmatprep.subr.bf16.mxu1 %v2904_v63  ;;  %v2930_v8 = vld [vmem:[%s4207_s3 + $0x120] ss:$24 sps:$4 sm:$0xff]  }
  0x26   :  { %v280_v43 = vadd.f32 %v279_v34, %v278_v37  ;;  %v293_v44 = vadd.f32 %v292_v36, %v291_v39  ;;  %v300_v53 = vsel %vm167_vm0, %v134_v46, 0.0  ;;  %2735 = vmatprep.subr.mxu0 %v3158_v56  ;;  %2737 = vmatprep.mubr.msk.f32.mxu0 %vm3159_vm1, %v3158_v56  ;;  %v329_v10 = vlaneseq  ;;  %v2901_v46 = vld [vmem:[%s4207_s3 + $0x38] ss:$24 sps:$4 sm:$0xff]   ;;  %v2934_v58 = vld [vmem:[%s4207_s3 + $0x154] ss:$24 sps:$4 sm:$0xff]  }
  0x27   :  { %268 = vadd.xlane.f32.xlu1 %v267_v40  ;;  %2736 = vmatpush3.msk.msra.mxu0 %vm167_vm0, %v313_v57  ;;  %vm367_vm4 = vcmask 1043459   ;;  %vm369_vm5 = vcmask 1044484   ;;  %vm371_vm6 = vcmask 1045509   ;;  %vm373_vm7 = vcmask 1046534   ;;  %v2931_v57 = vld [vmem:[%s4207_s3 + $0x128] ss:$24 sps:$4 sm:$0xff]  }
  0x28   :  { %v282_v48 = vadd.f32 %v281_v41, %v280_v43  ;;  %v295_v49 = vadd.f32 %v294_v42, %v293_v44  ;;  %816 = vmatprep.subr.bf16.mxu0 %v2897_v60  ;;  %780 = vmatpush1.bf16.msra.mxu1 %v2906_v0  ;;  %v330_v13 = vand.u32 127, %v329_v10  ;;  %v3435_v14 = vshrl.u32 %v329_v10, 7  ;;  %v2895_v43 = vld [vmem:[%s4207_s3 + $0x8] ss:$24 sps:$4 sm:$0xff]   ;;  %v2903_v44 = vld [vmem:[%s4207_s3 + $0x3c] ss:$24 sps:$4 sm:$0xff]  }
  0x29   :  { %781 = vmatprep.subr.bf16.mxu1 %v2910_v1  ;;  %vm375_vm8 = vcmask 1047559   ;;  %vm377_vm9 = vcmask 23552   ;;  %v2936_v59 = vld [vmem:[%s4207_s3 + $0x150] ss:$24 sps:$4 sm:$0xff]   ;;  %v2939_v60 = vld [vmem:[%s4207_s3 + $0x15c] ss:$24 sps:$4 sm:$0xff]  }
  0x2a   :  { %v284_v51 = vadd.f32 %v283_v45, %v282_v48  ;;  %v297_v52 = vadd.f32 %v296_v47, %v295_v49  ;;  %v333_v16 = vsub.s32 %v330_v13, %v3435_v14  ;;  %v2909_v47 = vld [vmem:[%s4207_s3 + $0x6c] ss:$24 sps:$4 sm:$0xff]   ;;  %v2907_v48 = vld [vmem:[%s4207_s3 + $0x68] ss:$24 sps:$4 sm:$0xff]   ;;  %v2915_v49 = vld [vmem:[%s4207_s3 + $0x9c] ss:$24 sps:$4 sm:$0xff]  }
  0x2b   :  { %v2937_v61 = vld [vmem:[%s4207_s3 + $0x158] ss:$24 sps:$4 sm:$0xff]   ;;  %v2942_v62 = vld [vmem:[%s4207_s3 + $0x14] ss:$24 sps:$4 sm:$0xff]   ;;  %v3160_v63 = vmov 0   ;;  %vm2194_vm10 = vcmask 1043456  }
  0x2c   :  { %285 = vadd.xlane.f32.xlu0 %v284_v51  ;;  %v299_v54 = vadd.f32 %v298_v50, %v297_v52  ;;  %782 = vmatpush1.bf16.msra.mxu1 %v2912_v2  ;;  %v2913_v50 = vld [vmem:[%s4207_s3 + $0x98] ss:$24 sps:$4 sm:$0xff]   ;;  %v2921_v51 = vld [vmem:[%s4207_s3 + $0xcc] ss:$24 sps:$4 sm:$0xff]   ;;  %v2919_v52 = vld [vmem:[%s4207_s3 + $0xc8] ss:$24 sps:$4 sm:$0xff]  }
  0x2d   :  { %783 = vmatprep.subr.bf16.mxu1 %v2916_v3  ;;  %807 = vmatprep.mubr.bf16.mxu1 %v3160_v63  ;;  %v2966_v0 = vld [vmem:[%s4208_s5 + $0x4] ss:$12 sps:$4 sm:$0xff]   ;;  %v2415_v1 = vld [vmem:[%s4209_s2] ss:$0 sm:$0xff]  ;;  %v2969_v10 = vld [vmem:[%s4208_s5 + $0x1c] ss:$12 sps:$4 sm:$0xff]  }
  0x2e   :  { %v301_v55 = vadd.f32 %v300_v53, %v299_v54  ;;  %v2927_v53 = vld [vmem:[%s4207_s3 + $0xfc] ss:$24 sps:$4 sm:$0xff]   ;;  %v2925_v54 = vld [vmem:[%s4207_s3 + $0xf8] ss:$24 sps:$4 sm:$0xff]   ;;  %vm3162_vm11 = vmmov 1   ;;  %vm2190_vm13 = vcmask 97280  }
  0x2f   :  { %v2967_v13 = vld [vmem:[%s4208_s5 + $0x18] ss:$12 sps:$4 sm:$0xff]   ;;  %vm2784_vm12 = vmpackc.low %vm2194_vm10, %vm3162_vm11 }
  0x30   :  { %302 = vadd.xlane.f32.xlu1 %v301_v55  ;;  %784 = vmatpush1.bf16.msra.mxu1 %v2918_v4  ;;  %v2933_v55 = vld [vmem:[%s4207_s3 + $0x12c] ss:$24 sps:$4 sm:$0xff]  }
  0x31   :  { %785 = vmatprep.subr.bf16.mxu1 %v2922_v5 }
  0x34   :  { %786 = vmatpush1.bf16.msra.mxu1 %v2924_v6  ;;  %v2940_v6 = vld [vmem:[%s4207_s3 + $0x10] ss:$24 sps:$4 sm:$0xff]  }
  0x35   :  { %787 = vmatprep.subr.bf16.mxu1 %v2928_v7 }
  0x38   :  { %788 = vmatpush1.bf16.msra.mxu1 %v2930_v8  ;;  %v2945_v8 = vld [vmem:[%s4207_s3 + $0x44] ss:$24 sps:$4 sm:$0xff]  }
  0x39   :  { %789 = vmatprep.subr.bf16.mxu1 %v2934_v58  ;;  %v3008_v58 = vld [vmem:[%s4208_s5 + $0x120] ss:$12 sps:$4 sm:$0xff]  }
  0x3c   :  { %790 = vmatpush1.bf16.msra.mxu1 %v2936_v59  ;;  %v3016_v59 = vld [vmem:[%s4208_s5 + $0x140] ss:$12 sps:$4 sm:$0xff]  }
  0x3d   :  { %857 = vmatprep.subr.bf16.mxu1 %v2942_v62  ;;  %v3013_v62 = vld [vmem:[%s4208_s5 + $0x138] ss:$12 sps:$4 sm:$0xff]  }
  0xa0   :  { %v184_v9 = vpop.xlane.xlu0 %183 }
  0xa1   :  { %v218_v11 = vpop.xlane.xlu1 %217  ;;  %v305_v17 = vmul.f32 0.0009765625, %v184_v9  ;;  %v2964_v9 = vld [vmem:[%s4208_s5] ss:$12 sps:$4 sm:$0xff]  }
  0xa2   :  { %v307_v20 = vmul.f32 0.0009765625, %v218_v11  ;;  %v2943_v11 = vld [vmem:[%s4207_s3 + $0x40] ss:$24 sps:$4 sm:$0xff]  }
  0xa3   :  { %v334_v21 = vrot.slane %v305_v17, %v333_v16  ;;  %v2951_v17 = vld [vmem:[%s4207_s3 + $0xa4] ss:$24 sps:$4 sm:$0xff]  }
  0xa4   :  { %v342_v25 = vrot.slane %v307_v20, %v333_v16  ;;  %v2949_v20 = vld [vmem:[%s4207_s3 + $0xa0] ss:$24 sps:$4 sm:$0xff]  }
  0xa5   :  { %v201_v12 = vpop.xlane.xlu0 %200 }
  0xa6   :  { %v306_v15 = vmul.f32 0.0009765625, %v201_v12  ;;  %v2948_v12 = vld [vmem:[%s4207_s3 + $0x74] ss:$24 sps:$4 sm:$0xff]  }
  0xa8   :  { %v338_v19 = vrot.slane %v306_v15, %v333_v16  ;;  %v2972_v15 = vld [vmem:[%s4208_s5 + $0x34] ss:$12 sps:$4 sm:$0xff]  }
  0xaa   :  { %v235_v18 = vpop.xlane.xlu1 %234  ;;  %v364_v24 = vsel %vm363_vm2, %v338_v19, %v334_v21  ;;  %v2975_v19 = vld [vmem:[%s4208_s5 + $0x4c] ss:$12 sps:$4 sm:$0xff]  }
  0xab   :  { %v308_v22 = vmul.f32 0.0009765625, %v235_v18  ;;  %v366_v29 = vsel %vm365_vm3, %v342_v25, %v364_v24  ;;  %v2970_v18 = vld [vmem:[%s4208_s5 + $0x30] ss:$12 sps:$4 sm:$0xff]   ;;  %v2954_v21 = vld [vmem:[%s4207_s3 + $0xd4] ss:$24 sps:$4 sm:$0xff]  }
  0xac   :  { %v2952_v24 = vld [vmem:[%s4207_s3 + $0xd0] ss:$24 sps:$4 sm:$0xff]   ;;  %v2957_v25 = vld [vmem:[%s4207_s3 + $0x104] ss:$24 sps:$4 sm:$0xff]  }
  0xad   :  { %v346_v27 = vrot.slane %v308_v22, %v333_v16  ;;  %v2973_v22 = vld [vmem:[%s4208_s5 + $0x48] ss:$12 sps:$4 sm:$0xff]  }
  0xaf   :  { %v252_v23 = vpop.xlane.xlu0 %251  ;;  %v368_v32 = vsel %vm367_vm4, %v346_v27, %v366_v29  ;;  %v2981_v27 = vld [vmem:[%s4208_s5 + $0x7c] ss:$12 sps:$4 sm:$0xff]   ;;  %v2960_v29 = vld [vmem:[%s4207_s3 + $0x134] ss:$24 sps:$4 sm:$0xff]  }
  0xb0   :  { %v309_v26 = vmul.f32 0.0009765625, %v252_v23  ;;  %v2978_v23 = vld [vmem:[%s4208_s5 + $0x64] ss:$12 sps:$4 sm:$0xff]  }
  0xb2   :  { %v350_v31 = vrot.slane %v309_v26, %v333_v16  ;;  %v2976_v26 = vld [vmem:[%s4208_s5 + $0x60] ss:$12 sps:$4 sm:$0xff]  }
  0xb4   :  { %v269_v28 = vpop.xlane.xlu1 %268  ;;  %v370_v36 = vsel %vm369_vm5, %v350_v31, %v368_v32  ;;  %v2984_v31 = vld [vmem:[%s4208_s5 + $0x94] ss:$12 sps:$4 sm:$0xff]   ;;  %v2958_v32 = vld [vmem:[%s4207_s3 + $0x130] ss:$24 sps:$4 sm:$0xff]  }
  0xb5   :  { %v310_v30 = vmul.f32 0.0009765625, %v269_v28  ;;  %v2955_v28 = vld [vmem:[%s4207_s3 + $0x100] ss:$24 sps:$4 sm:$0xff]  }
  0xb7   :  { %v354_v34 = vrot.slane %v310_v30, %v333_v16  ;;  %v2979_v30 = vld [vmem:[%s4208_s5 + $0x78] ss:$12 sps:$4 sm:$0xff]  }
  0xb9   :  { %v286_v33 = vpop.xlane.xlu0 %285  ;;  %v372_v39 = vsel %vm371_vm6, %v354_v34, %v370_v36  ;;  %v2982_v34 = vld [vmem:[%s4208_s5 + $0x90] ss:$12 sps:$4 sm:$0xff]   ;;  %v2961_v36 = vld [vmem:[%s4207_s3 + $0x160] ss:$24 sps:$4 sm:$0xff]  }
  0xba   :  { %v311_v35 = vmul.f32 0.0009765625, %v286_v33  ;;  %v2963_v33 = vld [vmem:[%s4207_s3 + $0x164] ss:$24 sps:$4 sm:$0xff]  }
  0xbc   :  { %v358_v37 = vrot.slane %v311_v35, %v333_v16  ;;  %v2987_v35 = vld [vmem:[%s4208_s5 + $0xac] ss:$12 sps:$4 sm:$0xff]  }
  0xbd   :  { %v303_v38 = vpop.xlane.xlu1 %302 }
  0xbe   :  { %v312_v40 = vmul.f32 0.0009765625, %v303_v38  ;;  %v374_v41 = vsel %vm373_vm7, %v358_v37, %v372_v39  ;;  %v2985_v37 = vld [vmem:[%s4208_s5 + $0xa8] ss:$12 sps:$4 sm:$0xff]   ;;  %v2990_v39 = vld [vmem:[%s4208_s5 + $0xc4] ss:$12 sps:$4 sm:$0xff]  }
  0xbf   :  { %v2991_v38 = vld [vmem:[%s4208_s5 + $0xc8] ss:$12 sps:$4 sm:$0xff]  }
  0xc0   :  { %v362_v42 = vrot.slane %v312_v40, %v333_v16  ;;  %v2946_v16 = vld [vmem:[%s4207_s3 + $0x70] ss:$24 sps:$4 sm:$0xff]  }
  0xc1   :  { %v2992_v40 = vld [vmem:[%s4208_s5 + $0x8] ss:$12 sps:$4 sm:$0xff]  }
  0xc2   :  { %v376_v45 = vsel %vm375_vm8, %v362_v42, %v374_v41  ;;  %v2988_v41 = vld [vmem:[%s4208_s5 + $0xc0] ss:$12 sps:$4 sm:$0xff]  }
  0xc3   :  { %2738 = vmatmul.mubr.msk.f32.vlgmr.msra.gmra.mrb[0].mxu0 %vm377_vm9, %v376_v45  ;;  %v2996_v42 = vld [vmem:[%s4208_s5 + $0xe0] ss:$12 sps:$4 sm:$0xff]   ;;  %v2993_v45 = vld [vmem:[%s4208_s5 + $0xd8] ss:$12 sps:$4 sm:$0xff]  }
  0xc4   :  { %817 = vmatpush1.bf16.msra.mxu0 %v2895_v43  ;;  %848 = vmatprep.mubr.bf16.mxu0 %v3160_v63  ;;  %v2995_v43 = vld [vmem:[%s4208_s5 + $0xdc] ss:$12 sps:$4 sm:$0xff]  }
  0xc5   :  { %818 = vmatprep.subr.bf16.mxu0 %v2903_v44  ;;  %v2997_v44 = vld [vmem:[%s4208_s5 + $0x20] ss:$12 sps:$4 sm:$0xff]  }
  0xc8   :  { %819 = vmatpush1.bf16.msra.mxu0 %v2901_v46  ;;  %v3001_v46 = vld [vmem:[%s4208_s5 + $0xf8] ss:$12 sps:$4 sm:$0xff]  }
  0xc9   :  { %820 = vmatprep.subr.bf16.mxu0 %v2909_v47  ;;  %v3000_v47 = vld [vmem:[%s4208_s5 + $0xf4] ss:$12 sps:$4 sm:$0xff]  }
  0xcc   :  { %821 = vmatpush1.bf16.msra.mxu0 %v2907_v48  ;;  %v3002_v48 = vld [vmem:[%s4208_s5 + $0x38] ss:$12 sps:$4 sm:$0xff]  }
  0xcd   :  { %822 = vmatprep.subr.bf16.mxu0 %v2915_v49  ;;  %v2998_v49 = vld [vmem:[%s4208_s5 + $0xf0] ss:$12 sps:$4 sm:$0xff]  }
  0xd0   :  { %823 = vmatpush1.bf16.msra.mxu0 %v2913_v50  ;;  %v3006_v50 = vld [vmem:[%s4208_s5 + $0x110] ss:$12 sps:$4 sm:$0xff]  }
  0xd1   :  { %824 = vmatprep.subr.bf16.mxu0 %v2921_v51  ;;  %v3005_v51 = vld [vmem:[%s4208_s5 + $0x10c] ss:$12 sps:$4 sm:$0xff]  }
  0xd4   :  { %825 = vmatpush1.bf16.msra.mxu0 %v2919_v52  ;;  %v3007_v52 = vld [vmem:[%s4208_s5 + $0x50] ss:$12 sps:$4 sm:$0xff]  }
  0xd5   :  { %826 = vmatprep.subr.bf16.mxu0 %v2927_v53  ;;  %v3003_v53 = vld [vmem:[%s4208_s5 + $0x108] ss:$12 sps:$4 sm:$0xff]  }
  0xd8   :  { %827 = vmatpush1.bf16.msra.mxu0 %v2925_v54  ;;  %v3011_v54 = vld [vmem:[%s4208_s5 + $0x128] ss:$12 sps:$4 sm:$0xff]  }
  0xd9   :  { %828 = vmatprep.subr.bf16.mxu0 %v2933_v55  ;;  %v3010_v55 = vld [vmem:[%s4208_s5 + $0x124] ss:$12 sps:$4 sm:$0xff]  }
  0xdc   :  { %829 = vmatpush1.bf16.msra.mxu0 %v2931_v57  ;;  %v3012_v57 = vld [vmem:[%s4208_s5 + $0x68] ss:$12 sps:$4 sm:$0xff]  }
  0xdd   :  { %830 = vmatprep.subr.bf16.mxu0 %v2939_v60  ;;  %v3015_v60 = vld [vmem:[%s4208_s5 + $0x13c] ss:$12 sps:$4 sm:$0xff]  }
  0xe0   :  { %831 = vmatpush1.bf16.msra.mxu0 %v2937_v61  ;;  %v3017_v61 = vld [vmem:[%s4208_s5 + $0x80] ss:$12 sps:$4 sm:$0xff]  }
  0xe1   :  { %1887 = vmatprep.subr.bf16.mxu0 %v2966_v0  ;;  %v3021_v0 = vld [vmem:[%s4208_s5 + $0x158] ss:$12 sps:$4 sm:$0xff]  }
 0x196   :  { %v449_v2 = vpop.f32.mrb[0].mxu0 }
 0x197   :  { %v450_v3 = vadd.f32 %v2415_v1, %v449_v2  ;;  %v2739_v4 = vpop.f32.mrb[1].mxu0  ;;  %v3018_v1 = vld [vmem:[%s4208_s5 + $0x150] ss:$12 sps:$4 sm:$0xff]   ;;  %v3022_v2 = vld [vmem:[%s4208_s5 + $0x98] ss:$12 sps:$4 sm:$0xff]  }
 0x198   :  { %v3026_v4 = vld [vmem:[%s4208_s5 + $0x170] ss:$12 sps:$4 sm:$0xff]  }
 0x199   :  { %v453_v5 = vmax.f32 %v450_v3, 0.0  ;;  %v3025_v3 = vld [vmem:[%s4208_s5 + $0x16c] ss:$12 sps:$4 sm:$0xff]  }
 0x19b   :  { %v3501_v7 = vpack.c.bf16 %v453_v5, %v453_v5  ;;  %v3023_v5 = vld [vmem:[%s4208_s5 + $0x168] ss:$12 sps:$4 sm:$0xff]  }
 0x19d   :  { %808 = vmatmul.mubr.bf16.vlgmr.msra.gmra.mrb[0].mxu1 %v3501_v7  ;;  %849 = vmatmul.mubr.bf16.vlgmr.msra.gmra.mrb[4].mxu0 %v3501_v7 }
 0x19e   :  { %858 = vmatpush1.bf16.msra.mxu1 %v2940_v6  ;;  %889 = vmatprep.mubr.bf16.mxu1 %v3160_v63  ;;  %v3020_v63 = vld [vmem:[%s4208_s5 + $0x154] ss:$12 sps:$4 sm:$0xff]   ;;  %v3027_v6 = vld [vmem:[%s4208_s5 + $0xb0] ss:$12 sps:$4 sm:$0xff]  }
 0x19f   :  { %859 = vmatprep.subr.bf16.mxu1 %v2945_v8  ;;  %1888 = vmatpush1.bf16.msra.mxu0 %v2964_v9  ;;  %v3031_v8 = vld [vmem:[%s4208_s5 + $0x248] ss:$12 sps:$4 sm:$0xff]   ;;  %v507_v9 = vsub.s32 0, %v3435_v14 }
 0x1a0   :  { %1889 = vmatprep.subr.bf16.mxu0 %v2969_v10  ;;  %v3699_v10 = vld [vmem:[%s4210_s4] sm:$0x3f] }
 0x1a2   :  { %860 = vmatpush1.bf16.msra.mxu1 %v2943_v11  ;;  %v511_v11 = vsub.s32 1, %v3435_v14 }
 0x1a3   :  { %861 = vmatprep.subr.bf16.mxu1 %v2948_v12  ;;  %1890 = vmatpush1.bf16.msra.mxu0 %v2967_v13  ;;  %v519_v12 = vsub.s32 3, %v3435_v14  ;;  %v508_v13 = vrot.slane %v3699_v10, %v507_v9 }
 0x1a4   :  { %1891 = vmatprep.subr.bf16.mxu0 %v2972_v15  ;;  %v512_v15 = vrot.slane %v3699_v10, %v511_v11 }
 0x1a6   :  { %862 = vmatpush1.bf16.msra.mxu1 %v2946_v16  ;;  %v520_v16 = vrot.slane %v3699_v10, %v519_v12  ;;  %v3067_v12 = vld [vmem:[%s4208_s5 + $0x230] ss:$12 sps:$4 sm:$0xff]  }
 0x1a7   :  { %863 = vmatprep.subr.bf16.mxu1 %v2951_v17  ;;  %1892 = vmatpush1.bf16.msra.mxu0 %v2970_v18 }
 0x1a8   :  { %1893 = vmatprep.subr.bf16.mxu0 %v2975_v19 }
 0x1aa   :  { %864 = vmatpush1.bf16.msra.mxu1 %v2949_v20 }
 0x1ab   :  { %865 = vmatprep.subr.bf16.mxu1 %v2954_v21  ;;  %1894 = vmatpush1.bf16.msra.mxu0 %v2973_v22 }
 0x1ac   :  { %1895 = vmatprep.subr.bf16.mxu0 %v2978_v23 }
 0x1ae   :  { %866 = vmatpush1.bf16.msra.mxu1 %v2952_v24 }
 0x1af   :  { %867 = vmatprep.subr.bf16.mxu1 %v2957_v25  ;;  %1896 = vmatpush1.bf16.msra.mxu0 %v2976_v26 }
 0x1b0   :  { %1897 = vmatprep.subr.bf16.mxu0 %v2981_v27 }
 0x1b2   :  { %868 = vmatpush1.bf16.msra.mxu1 %v2955_v28 }
 0x1b3   :  { %869 = vmatprep.subr.bf16.mxu1 %v2960_v29  ;;  %1898 = vmatpush1.bf16.msra.mxu0 %v2979_v30 }
 0x1b4   :  { %1899 = vmatprep.subr.bf16.mxu0 %v2984_v31 }
 0x1b6   :  { %870 = vmatpush1.bf16.msra.mxu1 %v2958_v32  ;;  %v3028_v32 = vld [vmem:[%s4208_s5 + $0x180] ss:$12 sps:$4 sm:$0xff]  }
 0x1b7   :  { %871 = vmatprep.subr.bf16.mxu1 %v2963_v33  ;;  %1900 = vmatpush1.bf16.msra.mxu0 %v2982_v34  ;;  %v3032_v33 = vld [vmem:[%s4208_s5 + $0x188] ss:$12 sps:$4 sm:$0xff]  }
 0x1b8   :  { %1901 = vmatprep.subr.bf16.mxu0 %v2987_v35  ;;  %v3035_v35 = vld [vmem:[%s4208_s5 + $0x19c] ss:$12 sps:$4 sm:$0xff]  }
 0x1ba   :  { %872 = vmatpush1.bf16.msra.mxu1 %v2961_v36  ;;  %v3036_v36 = vld [vmem:[%s4208_s5 + $0x260] ss:$12 sps:$4 sm:$0xff]  }
 0x1bb   :  { %1902 = vmatpush1.bf16.msra.mxu0 %v2985_v37  ;;  %2614 = vmatprep.subr.bf16.mxu1 %v2991_v38  ;;  %v3033_v38 = vld [vmem:[%s4208_s5 + $0x198] ss:$12 sps:$4 sm:$0xff]  }
 0x1bc   :  { %1903 = vmatprep.subr.bf16.mxu0 %v2990_v39  ;;  %v3037_v39 = vld [vmem:[%s4208_s5 + $0x1a0] ss:$12 sps:$4 sm:$0xff]  }
 0x1bd   :  { %890 = vmatmul.mubr.bf16.vlgmr.msra.gmra.mrb[4].mxu1 %v3501_v7  ;;  %v3030_v7 = vld [vmem:[%s4208_s5 + $0x184] ss:$12 sps:$4 sm:$0xff]  }
 0x1be   :  { %2615 = vmatpush3.bf16.msra.mxu1 %v2992_v40  ;;  %v3040_v40 = vld [vmem:[%s4208_s5 + $0x1b4] ss:$12 sps:$4 sm:$0xff]  }
 0x1bf   :  { %1904 = vmatpush1.bf16.msra.mxu0 %v2988_v41  ;;  %2616 = vmatprep.subr.bf16.mxu1 %v2996_v42  ;;  %v3041_v41 = vld [vmem:[%s4208_s5 + $0x278] ss:$12 sps:$4 sm:$0xff]   ;;  %v3038_v42 = vld [vmem:[%s4208_s5 + $0x1b0] ss:$12 sps:$4 sm:$0xff]  }
 0x1c0   :  { %1905 = vmatprep.subr.bf16.mxu0 %v2995_v43  ;;  %v3042_v43 = vld [vmem:[%s4208_s5 + $0x1b8] ss:$12 sps:$4 sm:$0xff]  }
 0x1c2   :  { %2617 = vmatpush3.bf16.msra.mxu1 %v2997_v44  ;;  %v3045_v44 = vld [vmem:[%s4208_s5 + $0x1cc] ss:$12 sps:$4 sm:$0xff]  }
 0x1c3   :  { %1906 = vmatpush1.bf16.msra.mxu0 %v2993_v45  ;;  %2618 = vmatprep.subr.bf16.mxu1 %v3001_v46  ;;  %v3046_v45 = vld [vmem:[%s4208_s5 + $0x290] ss:$12 sps:$4 sm:$0xff]   ;;  %v3043_v46 = vld [vmem:[%s4208_s5 + $0x1c8] ss:$12 sps:$4 sm:$0xff]  }
 0x1c4   :  { %1907 = vmatprep.subr.bf16.mxu0 %v3000_v47  ;;  %v3047_v47 = vld [vmem:[%s4208_s5 + $0x1d0] ss:$12 sps:$4 sm:$0xff]  }
 0x1c6   :  { %2619 = vmatpush3.bf16.msra.mxu1 %v3002_v48  ;;  %v3050_v48 = vld [vmem:[%s4208_s5 + $0x1e4] ss:$12 sps:$4 sm:$0xff]  }
 0x1c7   :  { %1908 = vmatpush1.bf16.msra.mxu0 %v2998_v49  ;;  %2620 = vmatprep.subr.bf16.mxu1 %v3006_v50  ;;  %v3051_v49 = vld [vmem:[%s4208_s5 + $0x2a8] ss:$12 sps:$4 sm:$0xff]   ;;  %v3048_v50 = vld [vmem:[%s4208_s5 + $0x1e0] ss:$12 sps:$4 sm:$0xff]  }
 0x1c8   :  { %1909 = vmatprep.subr.bf16.mxu0 %v3005_v51  ;;  %v3052_v51 = vld [vmem:[%s4208_s5 + $0x1e8] ss:$12 sps:$4 sm:$0xff]  }
 0x1ca   :  { %2621 = vmatpush3.bf16.msra.mxu1 %v3007_v52  ;;  %v515_v52 = vsub.s32 2, %v3435_v14 }
 0x1cb   :  { %1910 = vmatpush1.bf16.msra.mxu0 %v3003_v53  ;;  %2622 = vmatprep.subr.bf16.mxu1 %v3011_v54  ;;  %v3055_v53 = vld [vmem:[%s4208_s5 + $0x1fc] ss:$12 sps:$4 sm:$0xff]   ;;  %v3056_v54 = vld [vmem:[%s4208_s5 + $0x2c0] ss:$12 sps:$4 sm:$0xff]  }
 0x1cc   :  { %1911 = vmatprep.subr.bf16.mxu0 %v3010_v55  ;;  %v3053_v55 = vld [vmem:[%s4208_s5 + $0x1f8] ss:$12 sps:$4 sm:$0xff]  }
 0x1ce   :  { %2623 = vmatpush3.bf16.msra.mxu1 %v3012_v57  ;;  %v3057_v57 = vld [vmem:[%s4208_s5 + $0x200] ss:$12 sps:$4 sm:$0xff]  }
 0x1cf   :  { %1912 = vmatpush1.bf16.msra.mxu0 %v3008_v58  ;;  %2624 = vmatprep.subr.bf16.mxu1 %v3016_v59  ;;  %v527_v58 = vsub.s32 5, %v3435_v14  ;;  %v516_v59 = vrot.slane %v3699_v10, %v515_v52 }
 0x1d0   :  { %1913 = vmatprep.subr.bf16.mxu0 %v3015_v60  ;;  %v3060_v60 = vld [vmem:[%s4208_s5 + $0x214] ss:$12 sps:$4 sm:$0xff]  }
 0x1d2   :  { %2625 = vmatpush3.bf16.msra.mxu1 %v3017_v61  ;;  %v3061_v61 = vld [vmem:[%s4208_s5 + $0x2d8] ss:$12 sps:$4 sm:$0xff]  }
 0x1d3   :  { %1914 = vmatpush1.bf16.msra.mxu0 %v3013_v62  ;;  %2626 = vmatprep.subr.bf16.mxu1 %v3021_v0  ;;  %v528_v62 = vrot.slane %v3699_v10, %v527_v58  ;;  %v3062_v0 = vld [vmem:[%s4208_s5 + $0x218] ss:$12 sps:$4 sm:$0xff]  }
 0x1d4   :  { %1915 = vmatprep.subr.bf16.mxu0 %v3020_v63  ;;  %v3058_v63 = vld [vmem:[%s4208_s5 + $0x210] ss:$12 sps:$4 sm:$0xff]  }
 0x1d6   :  { %2627 = vmatpush3.bf16.msra.mxu1 %v3022_v2  ;;  %v3065_v2 = vld [vmem:[%s4208_s5 + $0x22c] ss:$12 sps:$4 sm:$0xff]  }
 0x1d7   :  { %1916 = vmatpush1.bf16.msra.mxu0 %v3018_v1  ;;  %2628 = vmatprep.subr.bf16.mxu1 %v3026_v4 }
 0x1d8   :  { %1917 = vmatprep.subr.bf16.mxu0 %v3025_v3  ;;  %v3066_v3 = vld [vmem:[%s4208_s5 + $0x2f0] ss:$12 sps:$4 sm:$0xff]  }
 0x1da   :  { %2629 = vmatpush3.bf16.msra.mxu1 %v3027_v6 }
 0x1db   :  { %1918 = vmatpush1.bf16.msra.mxu0 %v3023_v5  ;;  %2636 = vmatprep.subr.bf16.mxu1 %v3031_v8  ;;  %v3063_v8 = vld [vmem:[%s4208_s5 + $0x228] ss:$12 sps:$4 sm:$0xff]  }
 0x1dc   :  { %1928 = vmatprep.subr.bf16.mxu0 %v3030_v7 }
 0x270   :  { %v809_v17 = vpop.f32.mrb[0].mxu1  ;;  %v3710_v18 = vpop.f32.mrb[4].mxu0 }
 0x271   :  { %v810_v19 = vadd.f32 %v809_v17, %v508_v13  ;;  %v811_v20 = vpop.f32.mrb[1].mxu1  ;;  %v852_v21 = vpop.f32.mrb[5].mxu0  ;;  %v851_v1 = vadd.f32 %v3710_v18, %v516_v59  ;;  %v3071_v17 = vld [vmem:[%s4208_s5 + $0x3c8] ss:$12 sps:$4 sm:$0xff]  }
 0x272   :  { %v812_v22 = vadd.f32 %v811_v20, %v512_v15  ;;  %v853_v23 = vadd.f32 %v852_v21, %v520_v16  ;;  %v813_v24 = vpop.f32.mrb[2].mxu1  ;;  %v854_v25 = vpop.f32.mrb[6].mxu0  ;;  %v3070_v16 = vld [vmem:[%s4208_s5 + $0x244] ss:$12 sps:$4 sm:$0xff]   ;;  %v3072_v20 = vld [vmem:[%s4208_s5 + $0x308] ss:$12 sps:$4 sm:$0xff]  }
 0x273   :  { %v898_v26 = vmax.f32 %v810_v19, 0.0  ;;  %v814_v27 = vpop.f32.mrb[3].mxu1  ;;  %v855_v28 = vpop.f32.mrb[7].mxu0  ;;  %v900_v13 = vmax.f32 %v851_v1, 0.0  ;;  %v3068_v19 = vld [vmem:[%s4208_s5 + $0x240] ss:$12 sps:$4 sm:$0xff]  }
 0x274   :  { %v899_v29 = vmax.f32 %v812_v22, 0.0  ;;  %v901_v30 = vmax.f32 %v853_v23, 0.0  ;;  %v3075_v22 = vld [vmem:[%s4208_s5 + $0x25c] ss:$12 sps:$4 sm:$0xff]   ;;  %v3076_v23 = vld [vmem:[%s4208_s5 + $0x3e0] ss:$12 sps:$4 sm:$0xff]  }
 0x275   :  { %v904_v34 = vpack.c.bf16 %v898_v26, %v898_v26  ;;  %v3823_v21 = vpack.c.bf16 %v900_v13, %v900_v13  ;;  %v3073_v25 = vld [vmem:[%s4208_s5 + $0x258] ss:$12 sps:$4 sm:$0xff]   ;;  %v3077_v26 = vld [vmem:[%s4208_s5 + $0x320] ss:$12 sps:$4 sm:$0xff]   ;;  %v3113_v59 = vld [vmem:[%s4208_s5 + $0x31c] ss:$12 sps:$4 sm:$0xff]  }
 0x276   :  { %v905_v31 = vpack.c.bf16 %v899_v29, %v899_v29  ;;  %v907_v37 = vpack.c.bf16 %v901_v30, %v901_v30  ;;  %v3080_v27 = vld [vmem:[%s4208_s5 + $0x274] ss:$12 sps:$4 sm:$0xff]   ;;  %v3081_v28 = vld [vmem:[%s4208_s5 + $0x3f8] ss:$12 sps:$4 sm:$0xff]   ;;  %v3078_v29 = vld [vmem:[%s4208_s5 + $0x270] ss:$12 sps:$4 sm:$0xff]  }
 0x277   :  { %v3082_v30 = vld [vmem:[%s4208_s5 + $0x338] ss:$12 sps:$4 sm:$0xff]   ;;  %v3132_v13 = vld [vmem:[%s4208_s5 + $0x3c0] ss:$12 sps:$4 sm:$0xff]  }
 0x278   :  { %1919 = vmatprep.mubr.bf16.mxu0 %v905_v31  ;;  %2042 = vmatprep.mubr.bf16.mxu1 %v905_v31  ;;  %v3085_v31 = vld [vmem:[%s4208_s5 + $0x28c] ss:$12 sps:$4 sm:$0xff]   ;;  %v3122_v1 = vld [vmem:[%s4208_s5 + $0x364] ss:$12 sps:$4 sm:$0xff]  }
 0x279   :  { %1920 = vmatmul.mubr.bf16.vlgmr.msra.gmra.mrb[8].mxu0 %v904_v34  ;;  %2043 = vmatmul.mubr.bf16.vlgmr.msra.gmra.mrb[8].mxu1 %v904_v34  ;;  %v3087_v34 = vld [vmem:[%s4208_s5 + $0x350] ss:$12 sps:$4 sm:$0xff]  }
 0x27a   :  { %1929 = vmatpush1.bf16.msra.mxu0 %v3028_v32  ;;  %2637 = vmatpush3.bf16.msra.mxu1 %v3032_v33  ;;  %v3086_v32 = vld [vmem:[%s4208_s5 + $0x410] ss:$12 sps:$4 sm:$0xff]   ;;  %v3083_v33 = vld [vmem:[%s4208_s5 + $0x288] ss:$12 sps:$4 sm:$0xff]  }
 0x27b   :  { %1960 = vmatprep.mubr.bf16.mxu0 %v907_v37  ;;  %2082 = vmatprep.mubr.bf16.mxu1 %v907_v37  ;;  %v3088_v37 = vld [vmem:[%s4208_s5 + $0x2a0] ss:$12 sps:$4 sm:$0xff]  }
 0x27c   :  { %1930 = vmatprep.subr.bf16.mxu0 %v3035_v35  ;;  %2638 = vmatprep.subr.bf16.mxu1 %v3036_v36  ;;  %v3090_v35 = vld [vmem:[%s4208_s5 + $0x2a4] ss:$12 sps:$4 sm:$0xff]   ;;  %v3091_v36 = vld [vmem:[%s4208_s5 + $0x428] ss:$12 sps:$4 sm:$0xff]  }
 0x27e   :  { %1931 = vmatpush1.bf16.msra.mxu0 %v3033_v38  ;;  %2639 = vmatpush3.bf16.msra.mxu1 %v3037_v39  ;;  %v3092_v38 = vld [vmem:[%s4208_s5 + $0x368] ss:$12 sps:$4 sm:$0xff]   ;;  %v523_v39 = vsub.s32 4, %v3435_v14 }
 0x27f   :  { %1932 = vmatprep.subr.bf16.mxu0 %v3040_v40  ;;  %2640 = vmatprep.subr.bf16.mxu1 %v3041_v41  ;;  %v3095_v40 = vld [vmem:[%s4208_s5 + $0x2bc] ss:$12 sps:$4 sm:$0xff]   ;;  %v3096_v41 = vld [vmem:[%s4208_s5 + $0x440] ss:$12 sps:$4 sm:$0xff]  }
 0x280   :  { %v2172_v14 = vld [vmem:[%s4212_s7 + $0x108] sm:$0xff] }
 0x282   :  { %1933 = vmatpush1.bf16.msra.mxu0 %v3038_v42  ;;  %2641 = vmatpush3.bf16.msra.mxu1 %v3042_v43  ;;  %v3093_v42 = vld [vmem:[%s4208_s5 + $0x2b8] ss:$12 sps:$4 sm:$0xff]   ;;  %v3097_v43 = vld [vmem:[%s4208_s5 + $0x380] ss:$12 sps:$4 sm:$0xff]  }
 0x283   :  { %1934 = vmatprep.subr.bf16.mxu0 %v3045_v44  ;;  %2642 = vmatprep.subr.bf16.mxu1 %v3046_v45  ;;  %v524_v44 = vrot.slane %v3699_v10, %v523_v39  ;;  %v3100_v45 = vld [vmem:[%s4208_s5 + $0x2d4] ss:$12 sps:$4 sm:$0xff]   ;;  %v3102_v10 = vld [vmem:[%s4208_s5 + $0x398] ss:$12 sps:$4 sm:$0xff]  }
 0x284   :  { %v2187_v39 = vld [vmem:[%s4213_s9] sm:$0xff] }
 0x286   :  { %1935 = vmatpush1.bf16.msra.mxu0 %v3043_v46  ;;  %2643 = vmatpush3.bf16.msra.mxu1 %v3047_v47  ;;  %v3101_v46 = vld [vmem:[%s4208_s5 + $0x458] ss:$12 sps:$4 sm:$0xff]   ;;  %v3098_v47 = vld [vmem:[%s4208_s5 + $0x2d0] ss:$12 sps:$4 sm:$0xff]  }
 0x287   :  { %1936 = vmatprep.subr.bf16.mxu0 %v3050_v48  ;;  %2644 = vmatprep.subr.bf16.mxu1 %v3051_v49  ;;  %v3105_v49 = vld [vmem:[%s4208_s5 + $0x2ec] ss:$12 sps:$4 sm:$0xff]  }
 0x28a   :  { %1937 = vmatpush1.bf16.msra.mxu0 %v3048_v50  ;;  %2645 = vmatpush3.bf16.msra.mxu1 %v3052_v51  ;;  %v3106_v50 = vld [vmem:[%s4208_s5 + $0x470] ss:$12 sps:$4 sm:$0xff]   ;;  %v3103_v51 = vld [vmem:[%s4208_s5 + $0x2e8] ss:$12 sps:$4 sm:$0xff]  }
 0x28b   :  { %1938 = vmatprep.subr.bf16.mxu0 %v3055_v53  ;;  %2646 = vmatprep.subr.bf16.mxu1 %v3056_v54  ;;  %v3107_v53 = vld [vmem:[%s4208_s5 + $0x3b0] ss:$12 sps:$4 sm:$0xff]  }
 0x28e   :  { %1939 = vmatpush1.bf16.msra.mxu0 %v3053_v55  ;;  %2647 = vmatpush3.bf16.msra.mxu1 %v3057_v57  ;;  %v3110_v55 = vld [vmem:[%s4208_s5 + $0x304] ss:$12 sps:$4 sm:$0xff]   ;;  %v3108_v57 = vld [vmem:[%s4208_s5 + $0x300] ss:$12 sps:$4 sm:$0xff]  }
 0x28f   :  { %1940 = vmatprep.subr.bf16.mxu0 %v3060_v60  ;;  %2648 = vmatprep.subr.bf16.mxu1 %v3061_v61  ;;  %v3111_v60 = vld [vmem:[%s4208_s5 + $0x318] ss:$12 sps:$4 sm:$0xff]   ;;  %v3116_v61 = vld [vmem:[%s4208_s5 + $0x334] ss:$12 sps:$4 sm:$0xff]  }
 0x290   :  { %v3803_v4 = vpop.f32.mrb[4].mxu1 }
 0x291   :  { %v893_v5 = vpop.f32.mrb[5].mxu1  ;;  %v892_v48 = vadd.f32 %v3803_v4, %v524_v44  ;;  %v3123_v4 = vld [vmem:[%s4208_s5 + $0x378] ss:$12 sps:$4 sm:$0xff]  }
 0x292   :  { %v894_v6 = vadd.f32 %v893_v5, %v528_v62  ;;  %v895_v7 = vpop.f32.mrb[6].mxu1  ;;  %1941 = vmatpush1.bf16.msra.mxu0 %v3058_v63  ;;  %2649 = vmatpush3.bf16.msra.mxu1 %v3062_v0  ;;  %v3114_v62 = vld [vmem:[%s4208_s5 + $0x330] ss:$12 sps:$4 sm:$0xff]   ;;  %v3119_v63 = vld [vmem:[%s4208_s5 + $0x34c] ss:$12 sps:$4 sm:$0xff]  }
 0x293   :  { %v896_v15 = vpop.f32.mrb[7].mxu1  ;;  %1942 = vmatprep.subr.bf16.mxu0 %v3065_v2  ;;  %2650 = vmatprep.subr.bf16.mxu1 %v3066_v3  ;;  %v902_v54 = vmax.f32 %v892_v48, 0.0  ;;  %v3117_v0 = vld [vmem:[%s4208_s5 + $0x348] ss:$12 sps:$4 sm:$0xff]   ;;  %v3120_v2 = vld [vmem:[%s4208_s5 + $0x360] ss:$12 sps:$4 sm:$0xff]  }
 0x294   :  { %v903_v18 = vmax.f32 %v894_v6, 0.0  ;;  %v3125_v3 = vld [vmem:[%s4208_s5 + $0x37c] ss:$12 sps:$4 sm:$0xff]   ;;  %v3128_v5 = vld [vmem:[%s4208_s5 + $0x394] ss:$12 sps:$4 sm:$0xff]  }
 0x295   :  { %v3922_v58 = vpack.c.bf16 %v902_v54, %v902_v54  ;;  %v3126_v6 = vld [vmem:[%s4208_s5 + $0x390] ss:$12 sps:$4 sm:$0xff]   ;;  %v3131_v7 = vld [vmem:[%s4208_s5 + $0x3ac] ss:$12 sps:$4 sm:$0xff]   ;;  %v2143_v48 = vld [vmem:[%s4212_s7 + $0x20] sm:$0xff] }
 0x296   :  { %1943 = vmatpush1.bf16.msra.mxu0 %v3063_v8  ;;  %2651 = vmatpush3.bf16.msra.mxu1 %v3067_v12  ;;  %v3831_v24 = vpack.c.bf16 %v903_v18, %v903_v18  ;;  %v3129_v8 = vld [vmem:[%s4208_s5 + $0x3a8] ss:$12 sps:$4 sm:$0xff]   ;;  %v3134_v12 = vld [vmem:[%s4208_s5 + $0x3c4] ss:$12 sps:$4 sm:$0xff]   ;;  %v2142_v44 = vld [vmem:[%s4212_s7 + $0x18] sm:$0xff] }
 0x297   :  { %1944 = vmatprep.subr.bf16.mxu0 %v3070_v16  ;;  %2658 = vmatprep.subr.bf16.mxu1 %v3071_v17  ;;  %v3137_v15 = vld [vmem:[%s4208_s5 + $0x3dc] ss:$12 sps:$4 sm:$0xff]   ;;  %v3135_v16 = vld [vmem:[%s4208_s5 + $0x3d8] ss:$12 sps:$4 sm:$0xff]   ;;  %v3140_v17 = vld [vmem:[%s4208_s5 + $0x3f4] ss:$12 sps:$4 sm:$0xff]  }
 0x298   :  { %v3138_v18 = vld [vmem:[%s4208_s5 + $0x3f0] ss:$12 sps:$4 sm:$0xff]  }
 0x299   :  { %2083 = vmatmul.mubr.bf16.vlgmr.msra.gmra.mrb[12].mxu1 %v3823_v21 }
 0x29a   :  { %1945 = vmatpush1.bf16.msra.mxu0 %v3068_v19  ;;  %2659 = vmatpush3.bf16.msra.mxu1 %v3072_v20  ;;  %v3143_v19 = vld [vmem:[%s4208_s5 + $0x40c] ss:$12 sps:$4 sm:$0xff]   ;;  %v3141_v20 = vld [vmem:[%s4208_s5 + $0x408] ss:$12 sps:$4 sm:$0xff]  }
 0x29b   :  { %2122 = vmatprep.mubr.bf16.mxu1 %v3831_v24  ;;  %1946 = vmatprep.subr.bf16.mxu0 %v3075_v22  ;;  %v3144_v22 = vld [vmem:[%s4208_s5 + $0x420] ss:$12 sps:$4 sm:$0xff]  }
 0x29c   :  { %2660 = vmatprep.subr.bf16.mxu1 %v3076_v23  ;;  %v3149_v23 = vld [vmem:[%s4208_s5 + $0x43c] ss:$12 sps:$4 sm:$0xff]  }
 0x29e   :  { %1947 = vmatpush1.bf16.msra.mxu0 %v3073_v25  ;;  %2661 = vmatpush3.bf16.msra.mxu1 %v3077_v26  ;;  %v3152_v25 = vld [vmem:[%s4208_s5 + $0x454] ss:$12 sps:$4 sm:$0xff]   ;;  %v3150_v26 = vld [vmem:[%s4208_s5 + $0x450] ss:$12 sps:$4 sm:$0xff]  }
 0x29f   :  { %1948 = vmatprep.subr.bf16.mxu0 %v3080_v27  ;;  %2662 = vmatprep.subr.bf16.mxu1 %v3081_v28  ;;  %v3155_v27 = vld [vmem:[%s4208_s5 + $0x46c] ss:$12 sps:$4 sm:$0xff]   ;;  %v3153_v28 = vld [vmem:[%s4208_s5 + $0x468] ss:$12 sps:$4 sm:$0xff]  }
 0x2a2   :  { %1949 = vmatpush1.bf16.msra.mxu0 %v3078_v29  ;;  %2663 = vmatpush3.bf16.msra.mxu1 %v3082_v30  ;;  %v3161_v29 = vmov 0.0|0.0   ;;  %v2188_v30 = vld [vmem:[%s4211_s8] sm:$0xff] }
 0x2a3   :  { %1950 = vmatprep.subr.bf16.mxu0 %v3085_v31  ;;  %2664 = vmatprep.subr.bf16.mxu1 %v3086_v32  ;;  %v2189_v31 = vld [vmem:[%s4211_s8 + $0x8] sm:$0xf] }
 0x2a4   :  { %v2783_v32 = vpack.c.bf16 %v2189_v31, %v2188_v30 }
 0x2a6   :  { %1951 = vmatpush1.bf16.msra.mxu0 %v3083_v33  ;;  %2665 = vmatpush3.bf16.msra.mxu1 %v3087_v34  ;;  %v2155_v33 = vld [vmem:[%s4212_s7 + $0x80] sm:$0xff]  ;;  %v2156_v34 = vld [vmem:[%s4212_s7 + $0x88] sm:$0xff] }
 0x2a7   :  { %1952 = vmatprep.subr.bf16.mxu0 %v3090_v35  ;;  %2666 = vmatprep.subr.bf16.mxu1 %v3091_v36  ;;  %v2786_v35 = vpack.c.bf16 %v2156_v34, %v2155_v33  ;;  %v2139_v36 = vld [vmem:[%s4212_s7] sm:$0xff] }
 0x2aa   :  { %1953 = vmatpush1.bf16.msra.mxu0 %v3088_v37  ;;  %2667 = vmatpush3.bf16.msra.mxu1 %v3092_v38  ;;  %v2140_v37 = vld [vmem:[%s4212_s7 + $0x8] sm:$0xff]  ;;  %v2157_v38 = vld [vmem:[%s4212_s7 + $0x90] sm:$0xff] }
 0x2ab   :  { %1954 = vmatprep.subr.bf16.mxu0 %v3095_v40  ;;  %2668 = vmatprep.subr.bf16.mxu1 %v3096_v41  ;;  %v2788_v40 = vpack.c.bf16 %v2140_v37, %v2139_v36  ;;  %v2158_v41 = vld [vmem:[%s4212_s7 + $0x98] sm:$0xff] }
 0x2ae   :  { %1955 = vmatpush1.bf16.msra.mxu0 %v3093_v42  ;;  %2669 = vmatpush3.bf16.msra.mxu1 %v3097_v43  ;;  %v2790_v42 = vpack.c.bf16 %v2158_v41, %v2157_v38  ;;  %v2141_v43 = vld [vmem:[%s4212_s7 + $0x10] sm:$0xff] }
 0x2af   :  { %1956 = vmatprep.subr.bf16.mxu0 %v3100_v45  ;;  %2670 = vmatprep.subr.bf16.mxu1 %v3101_v46  ;;  %v2159_v45 = vld [vmem:[%s4212_s7 + $0xa0] sm:$0xff]  ;;  %v2160_v46 = vld [vmem:[%s4212_s7 + $0xa8] sm:$0xff] }
 0x2b2   :  { %1957 = vmatpush1.bf16.msra.mxu0 %v3098_v47  ;;  %2671 = vmatpush3.bf16.msra.mxu1 %v3102_v10  ;;  %v2792_v47 = vpack.c.bf16 %v2142_v44, %v2141_v43  ;;  %v2794_v10 = vpack.c.bf16 %v2160_v46, %v2159_v45 }
 0x2b3   :  { %1958 = vmatprep.subr.bf16.mxu0 %v3105_v49  ;;  %2672 = vmatprep.subr.bf16.mxu1 %v3106_v50  ;;  %v2144_v49 = vld [vmem:[%s4212_s7 + $0x28] sm:$0xff]  ;;  %v2161_v50 = vld [vmem:[%s4212_s7 + $0xb0] sm:$0xff] }
 0x2b6   :  { %1959 = vmatpush1.bf16.msra.mxu0 %v3103_v51  ;;  %2673 = vmatpush3.bf16.msra.mxu1 %v3107_v53  ;;  %v2162_v51 = vld [vmem:[%s4212_s7 + $0xb8] sm:$0xff]  ;;  %v2796_v53 = vpack.c.bf16 %v2144_v49, %v2143_v48 }
 0x2b7   :  { %1969 = vmatprep.subr.bf16.mxu0 %v3110_v55  ;;  %2782 = vmatprep.subr.bf16.mxu1 %v3161_v29  ;;  %v2798_v54 = vpack.c.bf16 %v2162_v51, %v2161_v50  ;;  %v2145_v55 = vld [vmem:[%s4212_s7 + $0x30] sm:$0xff]  ;;  %v2134_v50 = vld [vmem:[%s4215_s10 + $0x8] sm:$0xff] }
 0x2b9   :  { %1961 = vmatmul.mubr.bf16.vlgmr.msra.gmra.mrb[8].mxu0 %v3823_v21  ;;  %2123 = vmatmul.mubr.bf16.vlgmr.msra.gmra.mrb[16].mxu1 %v3922_v58  ;;  %v3146_v21 = vld [vmem:[%s4208_s5 + $0x424] ss:$12 sps:$4 sm:$0xff]  }
 0x2ba   :  { %1970 = vmatpush1.bf16.msra.mxu0 %v3108_v57  ;;  %2001 = vmatprep.mubr.bf16.mxu0 %v3831_v24  ;;  %v3147_v24 = vld [vmem:[%s4208_s5 + $0x438] ss:$12 sps:$4 sm:$0xff]  }
 0x2bb   :  { %1971 = vmatprep.subr.bf16.mxu0 %v3113_v59  ;;  %2744 = vmatprep.mubr.msk.f32.mxu1 %vm3159_vm1, %v3158_v56  ;;  %v2146_v57 = vld [vmem:[%s4212_s7 + $0x38] sm:$0xff]  ;;  %v2164_v59 = vld [vmem:[%s4212_s7 + $0xc8] sm:$0xff] }
 0x2bc   :  { %2785 = vmatpush3.bf16.msk.msra.mxu1 %vm2784_vm12, %v2783_v32 }
 0x2bd   :  { %2787 = vmatprep.subr.bf16.mxu1 %v2786_v35 }
 0x2be   :  { %1972 = vmatpush1.bf16.msra.mxu0 %v3111_v60  ;;  %v2800_v60 = vpack.c.bf16 %v2146_v57, %v2145_v55 }
 0x2bf   :  { %1973 = vmatprep.subr.bf16.mxu0 %v3116_v61 }
 0x2c1   :  { %2745 = vmatmul.mubr.msk.f32.vlgmr.msra.gmra.mrb[20].mxu1 %vm2190_vm13, %v2187_v39 }
 0x2c2   :  { %1974 = vmatpush1.bf16.msra.mxu0 %v3114_v62  ;;  %2789 = vmatpush3.bf16.msra.mxu1 %v2788_v40  ;;  %v2147_v62 = vld [vmem:[%s4212_s7 + $0x40] sm:$0xff] }
 0x2c3   :  { %1975 = vmatprep.subr.bf16.mxu0 %v3119_v63  ;;  %2791 = vmatprep.subr.bf16.mxu1 %v2790_v42  ;;  %v2148_v63 = vld [vmem:[%s4212_s7 + $0x48] sm:$0xff] }
 0x2c6   :  { %1976 = vmatpush1.bf16.msra.mxu0 %v3117_v0  ;;  %2793 = vmatpush3.bf16.msra.mxu1 %v2792_v47  ;;  %v2165_v0 = vld [vmem:[%s4212_s7 + $0xd0] sm:$0xff] }
 0x2c7   :  { %1977 = vmatprep.subr.bf16.mxu0 %v3122_v1  ;;  %2795 = vmatprep.subr.bf16.mxu1 %v2794_v10  ;;  %v2166_v1 = vld [vmem:[%s4212_s7 + $0xd8] sm:$0xff] }
 0x2ca   :  { %1978 = vmatpush1.bf16.msra.mxu0 %v3120_v2  ;;  %2797 = vmatpush3.bf16.msra.mxu1 %v2796_v53  ;;  %v2804_v2 = vpack.c.bf16 %v2148_v63, %v2147_v62  ;;  %v2171_v53 = vld [vmem:[%s4212_s7 + $0x100] sm:$0xff]  ;;  %v2176_v62 = vld [vmem:[%s4212_s7 + $0x128] sm:$0xff] }
 0x2cb   :  { %1979 = vmatprep.subr.bf16.mxu0 %v3125_v3  ;;  %2799 = vmatprep.subr.bf16.mxu1 %v2798_v54  ;;  %v2806_v3 = vpack.c.bf16 %v2166_v1, %v2165_v0  ;;  %v2819_v55 = vpack.c.bf16 %v2172_v14, %v2171_v53  ;;  %v2177_v0 = vld [vmem:[%s4212_s7 + $0x130] sm:$0xff] }
 0x2ce   :  { %1980 = vmatpush1.bf16.msra.mxu0 %v3123_v4  ;;  %2801 = vmatpush3.bf16.msra.mxu1 %v2800_v60  ;;  %v2149_v4 = vld [vmem:[%s4212_s7 + $0x50] sm:$0xff] }
 0x2cf   :  { %1981 = vmatprep.subr.bf16.mxu0 %v3128_v5  ;;  %v2150_v5 = vld [vmem:[%s4212_s7 + $0x58] sm:$0xff] }
 0x2d2   :  { %1982 = vmatpush1.bf16.msra.mxu0 %v3126_v6  ;;  %v2808_v6 = vpack.c.bf16 %v2150_v5, %v2149_v4  ;;  %v2181_v5 = vld [vmem:[%s4212_s7 + $0x150] sm:$0xff] }
 0x2d3   :  { %1983 = vmatprep.subr.bf16.mxu0 %v3131_v7  ;;  %v2167_v7 = vld [vmem:[%s4212_s7 + $0xe0] sm:$0xff] }
 0x2d6   :  { %1984 = vmatpush1.bf16.msra.mxu0 %v3129_v8  ;;  %v2168_v8 = vld [vmem:[%s4212_s7 + $0xe8] sm:$0xff] }
 0x2d7   :  { %1985 = vmatprep.subr.bf16.mxu0 %v3134_v12  ;;  %v2810_v12 = vpack.c.bf16 %v2168_v8, %v2167_v7  ;;  %v2183_v8 = vld [vmem:[%s4212_s7 + $0x160] sm:$0xff] }
 0x2da   :  { %1986 = vmatpush1.bf16.msra.mxu0 %v3132_v13  ;;  %v2151_v13 = vld [vmem:[%s4212_s7 + $0x60] sm:$0xff] }
 0x2db   :  { %1987 = vmatprep.subr.bf16.mxu0 %v3137_v15  ;;  %v2152_v15 = vld [vmem:[%s4212_s7 + $0x68] sm:$0xff] }
 0x2de   :  { %1988 = vmatpush1.bf16.msra.mxu0 %v3135_v16 }
 0x2df   :  { %1989 = vmatprep.subr.bf16.mxu0 %v3140_v17  ;;  %v2812_v17 = vpack.c.bf16 %v2152_v15, %v2151_v13  ;;  %v2185_v15 = vld [vmem:[%s4212_s7 + $0x170] sm:$0xff] }
 0x2e2   :  { %1990 = vmatpush1.bf16.msra.mxu0 %v3138_v18 }
 0x2e3   :  { %1991 = vmatprep.subr.bf16.mxu0 %v3143_v19 }
 0x2e6   :  { %1992 = vmatpush1.bf16.msra.mxu0 %v3141_v20 }
 0x2e7   :  { %1993 = vmatprep.subr.bf16.mxu0 %v3146_v21  ;;  %v2169_v21 = vld [vmem:[%s4212_s7 + $0xf0] sm:$0xff] }
 0x2ea   :  { %1994 = vmatpush1.bf16.msra.mxu0 %v3144_v22  ;;  %v2170_v22 = vld [vmem:[%s4212_s7 + $0xf8] sm:$0xff] }
 0x2eb   :  { %1995 = vmatprep.subr.bf16.mxu0 %v3149_v23 }
 0x2ee   :  { %1996 = vmatpush1.bf16.msra.mxu0 %v3147_v24  ;;  %v2814_v24 = vpack.c.bf16 %v2170_v22, %v2169_v21 }
 0x2ef   :  { %1997 = vmatprep.subr.bf16.mxu0 %v3152_v25  ;;  %v2153_v25 = vld [vmem:[%s4212_s7 + $0x70] sm:$0xff] }
 0x2f2   :  { %1998 = vmatpush1.bf16.msra.mxu0 %v3150_v26  ;;  %v2154_v26 = vld [vmem:[%s4212_s7 + $0x78] sm:$0xff] }
 0x2f3   :  { %1999 = vmatprep.subr.bf16.mxu0 %v3155_v27  ;;  %v2816_v27 = vpack.c.bf16 %v2154_v26, %v2153_v25 }
 0x2f6   :  { %2000 = vmatpush1.bf16.msra.mxu0 %v3153_v28  ;;  %v1102_v28 = vld [vmem:[%s4214_s6] sm:$0x7] }
 0x2f7   :  { %v1115_v30 = vrot.slane %v1102_v28, %v515_v52  ;;  %v1107_v44 = vrot.slane %v1102_v28, %v507_v9  ;;  %v1111_v45 = vrot.slane %v1102_v28, %v511_v11  ;;  %v2133_v9 = vld [vmem:[%s4215_s10] sm:$0xff] }
 0x2f9   :  { %2002 = vmatmul.mubr.bf16.vlgmr.msra.gmra.mrb[8].mxu0 %v3922_v58  ;;  %v2163_v58 = vld [vmem:[%s4212_s7 + $0xc0] sm:$0xff] }
 0x2fa   :  { %v2802_v61 = vpack.c.bf16 %v2164_v59, %v2163_v58  ;;  %v2173_v58 = vld [vmem:[%s4212_s7 + $0x110] sm:$0xff]  ;;  %v2174_v59 = vld [vmem:[%s4212_s7 + $0x118] sm:$0xff] }
 0x2fb   :  { %v2822_v60 = vpack.c.bf16 %v2174_v59, %v2173_v58 }
 0x2fc   :  { %2803 = vmatprep.subr.bf16.mxu1 %v2802_v61  ;;  %v2175_v61 = vld [vmem:[%s4212_s7 + $0x120] sm:$0xff] }
 0x2fd   :  { %2805 = vmatpush3.bf16.msra.mxu1 %v2804_v2  ;;  %v2825_v63 = vpack.c.bf16 %v2176_v62, %v2175_v61  ;;  %v2179_v2 = vld [vmem:[%s4212_s7 + $0x140] sm:$0xff] }
 0x2fe   :  { %2807 = vmatprep.subr.bf16.mxu1 %v2806_v3  ;;  %v2180_v3 = vld [vmem:[%s4212_s7 + $0x148] sm:$0xff] }
 0x2ff   :  { %v2831_v4 = vpack.c.bf16 %v2180_v3, %v2179_v2 }
 0x301   :  { %2809 = vmatpush3.bf16.msra.mxu1 %v2808_v6  ;;  %v2182_v6 = vld [vmem:[%s4212_s7 + $0x158] sm:$0xff] }
 0x302   :  { %2811 = vmatprep.subr.bf16.mxu1 %v2810_v12  ;;  %v2834_v7 = vpack.c.bf16 %v2182_v6, %v2181_v5  ;;  %v2184_v12 = vld [vmem:[%s4212_s7 + $0x168] sm:$0xff] }
 0x303   :  { %v2837_v13 = vpack.c.bf16 %v2184_v12, %v2183_v8 }
 0x305   :  { %2813 = vmatpush3.bf16.msra.mxu1 %v2812_v17 }
 0x306   :  { %2815 = vmatprep.subr.bf16.mxu1 %v2814_v24 }
 0x309   :  { %2817 = vmatpush3.bf16.msra.mxu1 %v2816_v27 }
 0x30a   :  { %2818 = vmatprep.subr.bf16.mxu1 %v3161_v29 }
 0x34c   :  { %v2630_v16 = vpop.f32.mrb[8].mxu1 }
 0x34d   :  { %v2631_v18 = vpop.f32.mrb[9].mxu1 }
 0x34e   :  { %v2632_v19 = vadd.f32 %v2631_v18, %v2630_v16  ;;  %v2633_v20 = vpop.f32.mrb[10].mxu1  ;;  %v2186_v16 = vld [vmem:[%s4212_s7 + $0x178] sm:$0xff] }
 0x34f   :  { %v2634_v23 = vpop.f32.mrb[11].mxu1  ;;  %v2840_v17 = vpack.c.bf16 %v2186_v16, %v2185_v15 }
 0x350   :  { %v2045_v33 = vadd.f32 %v2632_v19, %v1115_v30  ;;  %v2135_v19 = vld [vmem:[%s4215_s10 + $0x10] sm:$0xff] }
 0x36c   :  { %v2652_v31 = vpop.f32.mrb[12].mxu1 }
 0x36d   :  { %v2653_v32 = vpop.f32.mrb[13].mxu1 }
 0x36e   :  { %v2654_v34 = vadd.f32 %v2653_v32, %v2652_v31  ;;  %v2655_v35 = vpop.f32.mrb[14].mxu1 }
 0x36f   :  { %v2656_v36 = vpop.f32.mrb[15].mxu1 }
 0x370   :  { %v2085_v37 = vadd.f32 %v2654_v34, %v2045_v33 }
 0x38c   :  { %v2674_v38 = vpop.f32.mrb[16].mxu1 }
 0x38d   :  { %v2675_v39 = vpop.f32.mrb[17].mxu1 }
 0x38e   :  { %v2676_v40 = vadd.f32 %v2675_v39, %v2674_v38  ;;  %v2677_v41 = vpop.f32.mrb[18].mxu1 }
 0x38f   :  { %v2678_v42 = vpop.f32.mrb[19].mxu1 }
 0x390   :  { %v2125_v43 = vadd.f32 %v2676_v40, %v2085_v37 }
 0x392   :  { %v2132_v18 = vmax.f32 %v2125_v43, 0.0 }
 0x394   :  { %v2138_v20 = vmul.f32 %v2135_v19, %v2132_v18 }
 0x3cc   :  { %v2003_v52 = vpop.f32.mrb[8].mxu0 }
 0x3cd   :  { %v2842_v46 = vadd.f32 %v2003_v52, %v1107_v44  ;;  %v2005_v47 = vpop.f32.mrb[9].mxu0 }
 0x3ce   :  { %v2843_v10 = vadd.f32 %v2005_v47, %v1111_v45  ;;  %v2007_v48 = vpop.f32.mrb[10].mxu0 }
 0x3cf   :  { %v2130_v49 = vmax.f32 %v2842_v46, 0.0  ;;  %v2008_v51 = vpop.f32.mrb[11].mxu0 }
 0x3d0   :  { %v2131_v11 = vmax.f32 %v2843_v10, 0.0 }
 0x3d1   :  { %v2136_v57 = vmul.f32 %v2133_v9, %v2130_v49 }
 0x3d2   :  { %v2137_v54 = vmul.f32 %v2134_v50, %v2131_v11 }
 0x3d4   :  { %2332 = vmatprep.mubr.f32.mxu1 %v2137_v54 }
 0x3d5   :  { %2333 = vmatmul.mubr.f32.vlgmr.msra.gmra.mrb[22].mxu1 %v2136_v57 }
 0x3d6   :  { %2820 = vmatpush3.bf16.msra.mxu1 %v2819_v55  ;;  %2779 = vmatprep.mubr.msk.f32.mxu1 %vm3159_vm1, %v3158_v56  ;;  %v2178_v56 = vld [vmem:[%s4212_s7 + $0x138] sm:$0xff] }
 0x3d7   :  { %2821 = vmatprep.subr.bf16.mxu1 %v3161_v29  ;;  %v2828_v1 = vpack.c.bf16 %v2178_v56, %v2177_v0 }
 0x3da   :  { %2823 = vmatpush3.bf16.msra.mxu1 %v2822_v60 }
 0x3db   :  { %2824 = vmatprep.subr.bf16.mxu1 %v3161_v29 }
 0x3de   :  { %2826 = vmatpush3.bf16.msra.mxu1 %v2825_v63 }
 0x3df   :  { %2827 = vmatprep.subr.bf16.mxu1 %v3161_v29 }
 0x3e2   :  { %2829 = vmatpush3.bf16.msra.mxu1 %v2828_v1 }
 0x3e3   :  { %2830 = vmatprep.subr.bf16.mxu1 %v3161_v29 }
 0x3e6   :  { %2832 = vmatpush3.bf16.msra.mxu1 %v2831_v4 }
 0x3e7   :  { %2833 = vmatprep.subr.bf16.mxu1 %v3161_v29 }
 0x3ea   :  { %2835 = vmatpush3.bf16.msra.mxu1 %v2834_v7 }
 0x3eb   :  { %2836 = vmatprep.subr.bf16.mxu1 %v3161_v29 }
 0x3ee   :  { %2838 = vmatpush3.bf16.msra.mxu1 %v2837_v13 }
 0x3ef   :  { %2839 = vmatprep.subr.bf16.mxu1 %v3161_v29 }
 0x3f2   :  { %2841 = vmatpush3.bf16.msra.mxu1 %v2840_v17 }
 0x3f5   :  { %2780 = vmatmul.mubr.f32.vlgmr.msra.gmra.mrb[20].mxu1 %v2138_v20 }
 0x4a8   :  { %v2715_v21 = vpop.f32.mrb[22].mxu1 }
 0x4a9   :  { %v2716_v22 = vpop.f32.mrb[23].mxu1 }
 0x4aa   :  { %v2717_v23 = vadd.f32 %v2716_v22, %v2715_v21 }
 0x4c8   :  { %v2404_v24 = vpop.f32.mrb[20].mxu1 }
 0x4c9   :  { %v2844_v25 = vadd.f32 %v2717_v23, %v2404_v24  ;;  %v2781_v26 = vpop.f32.mrb[21].mxu1 }
 0x4cb   :  { %3156 = vtanh.f32 %v2844_v25 }
 0x4d5   :  { %v3157_v27 = vpop.eup %3156 }
 0x4d6   :  { %v2409_v28 = vmul.f32 3.1415927, %v3157_v27 }
 0x4d8   :  { %2410 = vst [vmem:[%s4216_s11] sm:$0xff] %v2409_v28 }

</bundles_post_ra>
